<compile_context>
chip_gen: v7x
topology: tpu7x:2x2x1
jax: 0.10.0
libtpu: 0.0.40
codegen_flags: <defaults>
</compile_context>

<pallas_src>
import math
import numpy as np
import jax
import jax.numpy as jnp
from jax.experimental import pallas as pl
from jax.experimental.pallas import tpu as pltpu

# ----- config['neuron'] / config['simulation'] (deterministic, in-script) -----
THETA     = 1.0    # spiking threshold
TAU_SR    = 4.0    # SRM (psp) time constant
TAU_REF   = 1.0    # refractory time constant
SCALE_REF = 2.0    # refractory scale
TS        = 1.0    # simulation time step
T_STEPS   = 16     # tSample / Ts
INV_TS    = 1.0 / TS

# ----- network sizes (CartPole-ish, small) -----
B      = 2     # batch
C_IN   = 4     # inputs (CartPole observation size)
HIDDEN = 32    # config['network']['hiddenSize']
N_OUT  = 2     # outputs (actions)

F_IN  = B * C_IN     # fused batch*input lanes
F1    = B * HIDDEN   # fused batch*hidden lanes (real)
F2    = B * N_OUT    # fused batch*output lanes (real)
LANES = 128          # padded lane width used for everything in-kernel
# TODO(synk): with more batch (B>=4) fold it into the lanes (F1 hits 128) or add a
# "parallel" grid axis over batch groups to use the second TensorCore on v7x.


def _alpha_kernel(tau, mult, t_sample, ts, eps=0.01):
    """SLAYER slayer._calculateAlphaKernel: mult * t/tau * exp(1 - t/tau), truncated."""
    vals = []
    t = 0.0
    while t < t_sample:
        v = mult * (t / tau) * math.exp(1.0 - t / tau)
        if abs(v) < eps and t > tau:
            break
        vals.append(v)
        t += ts
    return np.asarray(vals, dtype=np.float32)


SRM_KERNEL = _alpha_kernel(TAU_SR, 1.0, T_STEPS * TS, TS)
REF_KERNEL = _alpha_kernel(TAU_REF, -2.0 * THETA * SCALE_REF, T_STEPS * TS, TS)
NREF = int(REF_KERNEL.shape[0]) - 1            # taps injected into the future (k >= 1)
# Refractory taps as compile-time Python floats -> splat constants inside the kernel.
# They multiply the *binary* spike indicator (SLAYER semantics), so this stays exact
# for any TS (the 1/Ts amplitude is applied only to the emitted spike train).
REFK = [float(v) for v in REF_KERNEL]          # REFK[0] == 0.0, unused


def _psp_matrix():
    """Causal band matrix M so that (M @ u)[t] = Ts * sum_k srm[k] * u[t-k]."""
    m = np.zeros((T_STEPS, T_STEPS), dtype=np.float32)
    for t in range(T_STEPS):
        for s in range(T_STEPS):
            k = t - s
            if 0 <= k < SRM_KERNEL.shape[0]:
                m[t, s] = TS * SRM_KERNEL[k]
    return m


M_PSP = _psp_matrix()


def _spike_dynamics(u_ref, s_ref):
    """SLAYER getSpikes: sequential thresholding over time (statically unrolled).

    u_ref : (T, 128) membrane potential (psp output), read row-by-row (lane-dense).
    s_ref : (T, 128) spike train output, written row-by-row (lane-dense).
    Refractory feedback lives entirely in registers: each step adds
    REF_KERNEL[k] * spiked[t-k] (splat-constant multiplies of the register-resident
    spike history) instead of a windowed RMW on a VMEM membrane scratch.
    """
    spiked = []                                            # binary (1, 128) rows, in vregs
    for t in range(T_STEPS):                               # static unroll
        u_t = u_ref[pl.ds(t, 1), :]                        # (1, 128) lane-dense row load
        for k in range(1, min(t, NREF) + 1):               # refractory from spike history
            u_t = u_t + REFK[k] * spiked[t - k]
        row = (u_t >= THETA).astype(jnp.float32)
        spiked.append(row)
        s_ref[pl.ds(t, 1), :] = row * INV_TS               # off the serial critical path


def snn_kernel(mx_ref, w1_ref, w2_ref, m_ref, out_ref, u1_scr, s1_scr, u2_scr):
    # mx : (T, F_IN)   = M_psp @ x, layer-1 psp folded in via linearity (wrapper)
    # w1 : (F_IN, 128) block-diag fc1 weights, lanes zero-padded
    # w2 : (128, 128)  block-diag fc2 weights, zero-padded
    # m  : (T, T)      causal SRM filter (layer-2 psp)
    # out: (T, 128)    layer-2 spikes (lane-dense; real lanes sliced in wrapper)

    # ----- layer 1: u1 = psp(fc1(x)) = (M @ x) @ W1 (single matmul), then spike -----
    u1_scr[...] = jnp.dot(mx_ref[...], w1_ref[...], preferred_element_type=jnp.float32)
    _spike_dynamics(u1_scr, s1_scr)                        # spike_layer1

    # ----- layer 2: fc2 -> psp -> spike (spike() is nonlinear, so psp stays in-kernel) -----
    z2 = jnp.dot(s1_scr[...], w2_ref[...], preferred_element_type=jnp.float32)   # (T, 128)
    u2_scr[...] = jnp.dot(m_ref[...], z2, preferred_element_type=jnp.float32)    # (T, 128)
    _spike_dynamics(u2_scr, out_ref)                       # spike_layer2


def _pallas_forward(mx, w1_pad, w2_pad, m_psp):
    return pl.pallas_call(
        snn_kernel,
        out_shape=jax.ShapeDtypeStruct((T_STEPS, LANES), jnp.float32),
        in_specs=[
            pl.BlockSpec(memory_space=pltpu.MemorySpace.VMEM),   # Mx  (T, F_IN)
            pl.BlockSpec(memory_space=pltpu.MemorySpace.VMEM),   # w1  (F_IN, 128)
            pl.BlockSpec(memory_space=pltpu.MemorySpace.VMEM),   # w2  (128, 128)
            pl.BlockSpec(memory_space=pltpu.MemorySpace.VMEM),   # M   (T, T)
        ],
        out_specs=pl.BlockSpec(memory_space=pltpu.MemorySpace.VMEM),
        scratch_shapes=[
            pltpu.VMEM((T_STEPS, LANES), jnp.float32),   # u1 membrane
            pltpu.VMEM((T_STEPS, LANES), jnp.float32),   # s1 spikes
            pltpu.VMEM((T_STEPS, LANES), jnp.float32),   # u2 membrane
        ],
    )(mx, w1_pad, w2_pad, m_psp)


@jax.jit
def network_forward(spike_input, w1, w2):
    """spike_input: SLAYER layout (B, C_in, 1, 1, T); w1: (C_in, H); w2: (H, N_out)."""
    # layout glue: (B, C, 1, 1, T) -> (T, B*C); batch folded into lanes.
    x_tbc = jnp.transpose(spike_input.reshape(B, C_IN, T_STEPS),
                          (2, 0, 1)).reshape(T_STEPS, F_IN)

    m_psp = jnp.asarray(M_PSP)
    mx = jnp.dot(m_psp, x_tbc)             # layer-1 psp pre-applied (fc and psp commute)

    # Block-diagonal weights: one matmul covers every batch element; pad lanes to 128
    # so every in-kernel op / store is lane-dense (padded lanes stay 0, never spike).
    eye_b = jnp.eye(B, dtype=jnp.float32)
    w1_blk = jnp.kron(eye_b, w1)           # (B*C_in, B*H)
    w2_blk = jnp.kron(eye_b, w2)           # (B*H,   B*O)
    w1_pad = jnp.zeros((F_IN, LANES), jnp.float32).at[:, :F1].set(w1_blk)
    w2_pad = jnp.zeros((LANES, LANES), jnp.float32).at[:F1, :F2].set(w2_blk)

    out_pad = _pallas_forward(mx, w1_pad, w2_pad, m_psp)   # (T, 128)
    out_tf = out_pad[:, :F2]                               # real lanes (free slice)

    # Back to SLAYER layout (N, outputs, 1, 1, T) — pure glue.
    return jnp.transpose(out_tf.reshape(T_STEPS, B, N_OUT),
                         (1, 2, 0)).reshape(B, N_OUT, 1, 1, T_STEPS)


if __name__ == "__main__":
    key = jax.random.PRNGKey(0)
    k_in, k_w1, k_w2 = jax.random.split(key, 3)

    # PyTorch/SLAYER input layout: (N, C_in, 1, 1, T); spike amplitude 1/Ts.
    spike_input = (jax.random.bernoulli(k_in, 0.3, (B, C_IN, 1, 1, T_STEPS))
                   .astype(jnp.float32) / TS)

    # Deterministic parameter init (slayer.dense has no bias).
    w1 = (jax.random.normal(k_w1, (C_IN, HIDDEN)) / math.sqrt(C_IN)).astype(jnp.float32)
    w2 = (jax.random.normal(k_w2, (HIDDEN, N_OUT)) / math.sqrt(HIDDEN)).astype(jnp.float32)

    out = network_forward(spike_input, w1, w2)
    out = jax.block_until_ready(out)

    # TODO(synk): only the forward pass is implemented; SLAYER's surrogate-gradient
    # backward (spike/psp autograd) is out of scope for this kernel.
    print("KERNEL_OK")
</pallas_src>

<mosaic_0001>
module attributes {stable_mosaic.version = 11 : i64} {
  func.func @snn_kernel(%arg0: memref<16x8xf32, #tpu.memory_space<vmem>>, %arg1: memref<8x128xf32, #tpu.memory_space<vmem>>, %arg2: memref<128x128xf32, #tpu.memory_space<vmem>>, %arg3: memref<16x16xf32, #tpu.memory_space<vmem>>, %arg4: memref<16x128xf32, #tpu.memory_space<vmem>>, %arg5: memref<16x128xf32, #tpu.memory_space<vmem>>, %arg6: memref<16x128xf32, #tpu.memory_space<vmem>>, %arg7: memref<16x128xf32, #tpu.memory_space<vmem>>) attributes {dimension_semantics = [], scalar_prefetch = 0 : i64, scratch_operands = 3 : i64, tpu.core_type = #tpu.core_type<tc>} {
    %c0 = arith.constant 0 : index
    %c0_0 = arith.constant 0 : index
    %0 = vector.load %arg0[%c0, %c0_0] : memref<16x8xf32, #tpu.memory_space<vmem>>, vector<16x8xf32>
    %c0_1 = arith.constant 0 : index
    %c0_2 = arith.constant 0 : index
    %1 = vector.load %arg1[%c0_1, %c0_2] : memref<8x128xf32, #tpu.memory_space<vmem>>, vector<8x128xf32>
    %cst = arith.constant dense<0.000000e+00> : vector<16x128xf32>
    %2 = tpu.matmul %0, %1, %cst {dimension_numbers = #tpu.dot_dimension_numbers<[1], [0], [0], [1], [0, 0, 1, 1], [], []>} : vector<16x8xf32>, vector<8x128xf32>, vector<16x128xf32> -> vector<16x128xf32>
    %c0_3 = arith.constant 0 : index
    %c0_4 = arith.constant 0 : index
    %3 = vector.load %arg5[%c0_3, %c0_4] : memref<16x128xf32, #tpu.memory_space<vmem>>, vector<16x128xf32>
    tpu.vector_store %arg5[%c0_3, %c0_4], %2 {strides = array<i32>} : memref<16x128xf32, #tpu.memory_space<vmem>>, vector<16x128xf32>,
    %c0_5 = arith.constant 0 : index
    %c0_6 = arith.constant 0 : index
    %4 = vector.load %arg5[%c0_5, %c0_6] : memref<16x128xf32, #tpu.memory_space<vmem>>, vector<1x128xf32>
    %cst_7 = arith.constant 1.000000e+00 : f32
    %5 = vector.broadcast %cst_7 : f32 to vector<1x128xf32>
    %6 = arith.cmpf oge, %4, %5 : vector<1x128xf32>
    %7 = arith.extui %6 : vector<1x128xi1> to vector<1x128xi32>
    %8 = arith.sitofp %7 : vector<1x128xi32> to vector<1x128xf32>
    %cst_8 = arith.constant 1.000000e+00 : f32
    %9 = vector.broadcast %cst_8 : f32 to vector<1x128xf32>
    %10 = arith.mulf %8, %9 : vector<1x128xf32>
    %c0_9 = arith.constant 0 : index
    %c0_10 = arith.constant 0 : index
    %11 = vector.load %arg6[%c0_9, %c0_10] : memref<16x128xf32, #tpu.memory_space<vmem>>, vector<1x128xf32>
    tpu.vector_store %arg6[%c0_9, %c0_10], %10 {strides = array<i32>} : memref<16x128xf32, #tpu.memory_space<vmem>>, vector<1x128xf32>,
    %c1 = arith.constant 1 : index
    %c0_11 = arith.constant 0 : index
    %12 = vector.load %arg5[%c1, %c0_11] : memref<16x128xf32, #tpu.memory_space<vmem>>, vector<1x128xf32>
    %cst_12 = arith.constant -4.000000e+00 : f32
    %13 = vector.broadcast %cst_12 : f32 to vector<1x128xf32>
    %14 = arith.mulf %13, %8 : vector<1x128xf32>
    %15 = arith.addf %12, %14 : vector<1x128xf32>
    %cst_13 = arith.constant 1.000000e+00 : f32
    %16 = vector.broadcast %cst_13 : f32 to vector<1x128xf32>
    %17 = arith.cmpf oge, %15, %16 : vector<1x128xf32>
    %18 = arith.extui %17 : vector<1x128xi1> to vector<1x128xi32>
    %19 = arith.sitofp %18 : vector<1x128xi32> to vector<1x128xf32>
    %cst_14 = arith.constant 1.000000e+00 : f32
    %20 = vector.broadcast %cst_14 : f32 to vector<1x128xf32>
    %21 = arith.mulf %19, %20 : vector<1x128xf32>
    %c1_15 = arith.constant 1 : index
    %c0_16 = arith.constant 0 : index
    %22 = vector.load %arg6[%c1_15, %c0_16] : memref<16x128xf32, #tpu.memory_space<vmem>>, vector<1x128xf32>
    tpu.vector_store %arg6[%c1_15, %c0_16], %21 {strides = array<i32>} : memref<16x128xf32, #tpu.memory_space<vmem>>, vector<1x128xf32>,
    %c2 = arith.constant 2 : index
    %c0_17 = arith.constant 0 : index
    %23 = vector.load %arg5[%c2, %c0_17] : memref<16x128xf32, #tpu.memory_space<vmem>>, vector<1x128xf32>
    %cst_18 = arith.constant -4.000000e+00 : f32
    %24 = vector.broadcast %cst_18 : f32 to vector<1x128xf32>
    %25 = arith.mulf %24, %19 : vector<1x128xf32>
    %26 = arith.addf %23, %25 : vector<1x128xf32>
    %cst_19 = arith.constant -2.9430356 : f32
    %27 = vector.broadcast %cst_19 : f32 to vector<1x128xf32>
    %28 = arith.mulf %27, %8 : vector<1x128xf32>
    %29 = arith.addf %26, %28 : vector<1x128xf32>
    %cst_20 = arith.constant 1.000000e+00 : f32
    %30 = vector.broadcast %cst_20 : f32 to vector<1x128xf32>
    %31 = arith.cmpf oge, %29, %30 : vector<1x128xf32>
    %32 = arith.extui %31 : vector<1x128xi1> to vector<1x128xi32>
    %33 = arith.sitofp %32 : vector<1x128xi32> to vector<1x128xf32>
    %cst_21 = arith.constant 1.000000e+00 : f32
    %34 = vector.broadcast %cst_21 : f32 to vector<1x128xf32>
    %35 = arith.mulf %33, %34 : vector<1x128xf32>
    %c2_22 = arith.constant 2 : index
    %c0_23 = arith.constant 0 : index
    %36 = vector.load %arg6[%c2_22, %c0_23] : memref<16x128xf32, #tpu.memory_space<vmem>>, vector<1x128xf32>
    tpu.vector_store %arg6[%c2_22, %c0_23], %35 {strides = array<i32>} : memref<16x128xf32, #tpu.memory_space<vmem>>, vector<1x128xf32>,
    %c3 = arith.constant 3 : index
    %c0_24 = arith.constant 0 : index
    %37 = vector.load %arg5[%c3, %c0_24] : memref<16x128xf32, #tpu.memory_space<vmem>>, vector<1x128xf32>
    %cst_25 = arith.constant -4.000000e+00 : f32
    %38 = vector.broadcast %cst_25 : f32 to vector<1x128xf32>
    %39 = arith.mulf %38, %33 : vector<1x128xf32>
    %40 = arith.addf %37, %39 : vector<1x128xf32>
    %cst_26 = arith.constant -2.9430356 : f32
    %41 = vector.broadcast %cst_26 : f32 to vector<1x128xf32>
    %42 = arith.mulf %41, %19 : vector<1x128xf32>
    %43 = arith.addf %40, %42 : vector<1x128xf32>
    %cst_27 = arith.constant -1.62402344 : f32
    %44 = vector.broadcast %cst_27 : f32 to vector<1x128xf32>
    %45 = arith.mulf %44, %8 : vector<1x128xf32>
    %46 = arith.addf %43, %45 : vector<1x128xf32>
    %cst_28 = arith.constant 1.000000e+00 : f32
    %47 = vector.broadcast %cst_28 : f32 to vector<1x128xf32>
    %48 = arith.cmpf oge, %46, %47 : vector<1x128xf32>
    %49 = arith.extui %48 : vector<1x128xi1> to vector<1x128xi32>
    %50 = arith.sitofp %49 : vector<1x128xi32> to vector<1x128xf32>
    %cst_29 = arith.constant 1.000000e+00 : f32
    %51 = vector.broadcast %cst_29 : f32 to vector<1x128xf32>
    %52 = arith.mulf %50, %51 : vector<1x128xf32>
    %c3_30 = arith.constant 3 : index
    %c0_31 = arith.constant 0 : index
    %53 = vector.load %arg6[%c3_30, %c0_31] : memref<16x128xf32, #tpu.memory_space<vmem>>, vector<1x128xf32>
    tpu.vector_store %arg6[%c3_30, %c0_31], %52 {strides = array<i32>} : memref<16x128xf32, #tpu.memory_space<vmem>>, vector<1x128xf32>,
    %c4 = arith.constant 4 : index
    %c0_32 = arith.constant 0 : index
    %54 = vector.load %arg5[%c4, %c0_32] : memref<16x128xf32, #tpu.memory_space<vmem>>, vector<1x128xf32>
    %cst_33 = arith.constant -4.000000e+00 : f32
    %55 = vector.broadcast %cst_33 : f32 to vector<1x128xf32>
    %56 = arith.mulf %55, %50 : vector<1x128xf32>
    %57 = arith.addf %54, %56 : vector<1x128xf32>
    %cst_34 = arith.constant -2.9430356 : f32
    %58 = vector.broadcast %cst_34 : f32 to vector<1x128xf32>
    %59 = arith.mulf %58, %33 : vector<1x128xf32>
    %60 = arith.addf %57, %59 : vector<1x128xf32>
    %cst_35 = arith.constant -1.62402344 : f32
    %61 = vector.broadcast %cst_35 : f32 to vector<1x128xf32>
    %62 = arith.mulf %61, %19 : vector<1x128xf32>
    %63 = arith.addf %60, %62 : vector<1x128xf32>
    %cst_36 = arith.constant -0.79659307 : f32
    %64 = vector.broadcast %cst_36 : f32 to vector<1x128xf32>
    %65 = arith.mulf %64, %8 : vector<1x128xf32>
    %66 = arith.addf %63, %65 : vector<1x128xf32>
    %cst_37 = arith.constant 1.000000e+00 : f32
    %67 = vector.broadcast %cst_37 : f32 to vector<1x128xf32>
    %68 = arith.cmpf oge, %66, %67 : vector<1x128xf32>
    %69 = arith.extui %68 : vector<1x128xi1> to vector<1x128xi32>
    %70 = arith.sitofp %69 : vector<1x128xi32> to vector<1x128xf32>
    %cst_38 = arith.constant 1.000000e+00 : f32
    %71 = vector.broadcast %cst_38 : f32 to vector<1x128xf32>
    %72 = arith.mulf %70, %71 : vector<1x128xf32>
    %c4_39 = arith.constant 4 : index
    %c0_40 = arith.constant 0 : index
    %73 = vector.load %arg6[%c4_39, %c0_40] : memref<16x128xf32, #tpu.memory_space<vmem>>, vector<1x128xf32>
    tpu.vector_store %arg6[%c4_39, %c0_40], %72 {strides = array<i32>} : memref<16x128xf32, #tpu.memory_space<vmem>>, vector<1x128xf32>,
    %c5 = arith.constant 5 : index
    %c0_41 = arith.constant 0 : index
    %74 = vector.load %arg5[%c5, %c0_41] : memref<16x128xf32, #tpu.memory_space<vmem>>, vector<1x128xf32>
    %cst_42 = arith.constant -4.000000e+00 : f32
    %75 = vector.broadcast %cst_42 : f32 to vector<1x128xf32>
    %76 = arith.mulf %75, %70 : vector<1x128xf32>
    %77 = arith.addf %74, %76 : vector<1x128xf32>
    %cst_43 = arith.constant -2.9430356 : f32
    %78 = vector.broadcast %cst_43 : f32 to vector<1x128xf32>
    %79 = arith.mulf %78, %50 : vector<1x128xf32>
    %80 = arith.addf %77, %79 : vector<1x128xf32>
    %cst_44 = arith.constant -1.62402344 : f32
    %81 = vector.broadcast %cst_44 : f32 to vector<1x128xf32>
    %82 = arith.mulf %81, %33 : vector<1x128xf32>
    %83 = arith.addf %80, %82 : vector<1x128xf32>
    %cst_45 = arith.constant -0.79659307 : f32
    %84 = vector.broadcast %cst_45 : f32 to vector<1x128xf32>
    %85 = arith.mulf %84, %19 : vector<1x128xf32>
    %86 = arith.addf %83, %85 : vector<1x128xf32>
    %cst_46 = arith.constant -0.366312772 : f32
    %87 = vector.broadcast %cst_46 : f32 to vector<1x128xf32>
    %88 = arith.mulf %87, %8 : vector<1x128xf32>
    %89 = arith.addf %86, %88 : vector<1x128xf32>
    %cst_47 = arith.constant 1.000000e+00 : f32
    %90 = vector.broadcast %cst_47 : f32 to vector<1x128xf32>
    %91 = arith.cmpf oge, %89, %90 : vector<1x128xf32>
    %92 = arith.extui %91 : vector<1x128xi1> to vector<1x128xi32>
    %93 = arith.sitofp %92 : vector<1x128xi32> to vector<1x128xf32>
    %cst_48 = arith.constant 1.000000e+00 : f32
    %94 = vector.broadcast %cst_48 : f32 to vector<1x128xf32>
    %95 = arith.mulf %93, %94 : vector<1x128xf32>
    %c5_49 = arith.constant 5 : index
    %c0_50 = arith.constant 0 : index
    %96 = vector.load %arg6[%c5_49, %c0_50] : memref<16x128xf32, #tpu.memory_space<vmem>>, vector<1x128xf32>
    tpu.vector_store %arg6[%c5_49, %c0_50], %95 {strides = array<i32>} : memref<16x128xf32, #tpu.memory_space<vmem>>, vector<1x128xf32>,
    %c6 = arith.constant 6 : index
    %c0_51 = arith.constant 0 : index
    %97 = vector.load %arg5[%c6, %c0_51] : memref<16x128xf32, #tpu.memory_space<vmem>>, vector<1x128xf32>
    %cst_52 = arith.constant -4.000000e+00 : f32
    %98 = vector.broadcast %cst_52 : f32 to vector<1x128xf32>
    %99 = arith.mulf %98, %93 : vector<1x128xf32>
    %100 = arith.addf %97, %99 : vector<1x128xf32>
    %cst_53 = arith.constant -2.9430356 : f32
    %101 = vector.broadcast %cst_53 : f32 to vector<1x128xf32>
    %102 = arith.mulf %101, %70 : vector<1x128xf32>
    %103 = arith.addf %100, %102 : vector<1x128xf32>
    %cst_54 = arith.constant -1.62402344 : f32
    %104 = vector.broadcast %cst_54 : f32 to vector<1x128xf32>
    %105 = arith.mulf %104, %50 : vector<1x128xf32>
    %106 = arith.addf %103, %105 : vector<1x128xf32>
    %cst_55 = arith.constant -0.79659307 : f32
    %107 = vector.broadcast %cst_55 : f32 to vector<1x128xf32>
    %108 = arith.mulf %107, %33 : vector<1x128xf32>
    %109 = arith.addf %106, %108 : vector<1x128xf32>
    %cst_56 = arith.constant -0.366312772 : f32
    %110 = vector.broadcast %cst_56 : f32 to vector<1x128xf32>
    %111 = arith.mulf %110, %19 : vector<1x128xf32>
    %112 = arith.addf %109, %111 : vector<1x128xf32>
    %cst_57 = arith.constant -0.161710724 : f32
    %113 = vector.broadcast %cst_57 : f32 to vector<1x128xf32>
    %114 = arith.mulf %113, %8 : vector<1x128xf32>
    %115 = arith.addf %112, %114 : vector<1x128xf32>
    %cst_58 = arith.constant 1.000000e+00 : f32
    %116 = vector.broadcast %cst_58 : f32 to vector<1x128xf32>
    %117 = arith.cmpf oge, %115, %116 : vector<1x128xf32>
    %118 = arith.extui %117 : vector<1x128xi1> to vector<1x128xi32>
    %119 = arith.sitofp %118 : vector<1x128xi32> to vector<1x128xf32>
    %cst_59 = arith.constant 1.000000e+00 : f32
    %120 = vector.broadcast %cst_59 : f32 to vector<1x128xf32>
    %121 = arith.mulf %119, %120 : vector<1x128xf32>
    %c6_60 = arith.constant 6 : index
    %c0_61 = arith.constant 0 : index
    %122 = vector.load %arg6[%c6_60, %c0_61] : memref<16x128xf32, #tpu.memory_space<vmem>>, vector<1x128xf32>
    tpu.vector_store %arg6[%c6_60, %c0_61], %121 {strides = array<i32>} : memref<16x128xf32, #tpu.memory_space<vmem>>, vector<1x128xf32>,
    %c7 = arith.constant 7 : index
    %c0_62 = arith.constant 0 : index
    %123 = vector.load %arg5[%c7, %c0_62] : memref<16x128xf32, #tpu.memory_space<vmem>>, vector<1x128xf32>
    %cst_63 = arith.constant -4.000000e+00 : f32
    %124 = vector.broadcast %cst_63 : f32 to vector<1x128xf32>
    %125 = arith.mulf %124, %119 : vector<1x128xf32>
    %126 = arith.addf %123, %125 : vector<1x128xf32>
    %cst_64 = arith.constant -2.9430356 : f32
    %127 = vector.broadcast %cst_64 : f32 to vector<1x128xf32>
    %128 = arith.mulf %127, %93 : vector<1x128xf32>
    %129 = arith.addf %126, %128 : vector<1x128xf32>
    %cst_65 = arith.constant -1.62402344 : f32
    %130 = vector.broadcast %cst_65 : f32 to vector<1x128xf32>
    %131 = arith.mulf %130, %70 : vector<1x128xf32>
    %132 = arith.addf %129, %131 : vector<1x128xf32>
    %cst_66 = arith.constant -0.79659307 : f32
    %133 = vector.broadcast %cst_66 : f32 to vector<1x128xf32>
    %134 = arith.mulf %133, %50 : vector<1x128xf32>
    %135 = arith.addf %132, %134 : vector<1x128xf32>
    %cst_67 = arith.constant -0.366312772 : f32
    %136 = vector.broadcast %cst_67 : f32 to vector<1x128xf32>
    %137 = arith.mulf %136, %33 : vector<1x128xf32>
    %138 = arith.addf %135, %137 : vector<1x128xf32>
    %cst_68 = arith.constant -0.161710724 : f32
    %139 = vector.broadcast %cst_68 : f32 to vector<1x128xf32>
    %140 = arith.mulf %139, %19 : vector<1x128xf32>
    %141 = arith.addf %138, %140 : vector<1x128xf32>
    %cst_69 = arith.constant -0.069405064 : f32
    %142 = vector.broadcast %cst_69 : f32 to vector<1x128xf32>
    %143 = arith.mulf %142, %8 : vector<1x128xf32>
    %144 = arith.addf %141, %143 : vector<1x128xf32>
    %cst_70 = arith.constant 1.000000e+00 : f32
    %145 = vector.broadcast %cst_70 : f32 to vector<1x128xf32>
    %146 = arith.cmpf oge, %144, %145 : vector<1x128xf32>
    %147 = arith.extui %146 : vector<1x128xi1> to vector<1x128xi32>
    %148 = arith.sitofp %147 : vector<1x128xi32> to vector<1x128xf32>
    %cst_71 = arith.constant 1.000000e+00 : f32
    %149 = vector.broadcast %cst_71 : f32 to vector<1x128xf32>
    %150 = arith.mulf %148, %149 : vector<1x128xf32>
    %c7_72 = arith.constant 7 : index
    %c0_73 = arith.constant 0 : index
    %151 = vector.load %arg6[%c7_72, %c0_73] : memref<16x128xf32, #tpu.memory_space<vmem>>, vector<1x128xf32>
    tpu.vector_store %arg6[%c7_72, %c0_73], %150 {strides = array<i32>} : memref<16x128xf32, #tpu.memory_space<vmem>>, vector<1x128xf32>,
    %c8 = arith.constant 8 : index
    %c0_74 = arith.constant 0 : index
    %152 = vector.load %arg5[%c8, %c0_74] : memref<16x128xf32, #tpu.memory_space<vmem>>, vector<1x128xf32>
    %cst_75 = arith.constant -4.000000e+00 : f32
    %153 = vector.broadcast %cst_75 : f32 to vector<1x128xf32>
    %154 = arith.mulf %153, %148 : vector<1x128xf32>
    %155 = arith.addf %152, %154 : vector<1x128xf32>
    %cst_76 = arith.constant -2.9430356 : f32
    %156 = vector.broadcast %cst_76 : f32 to vector<1x128xf32>
    %157 = arith.mulf %156, %119 : vector<1x128xf32>
    %158 = arith.addf %155, %157 : vector<1x128xf32>
    %cst_77 = arith.constant -1.62402344 : f32
    %159 = vector.broadcast %cst_77 : f32 to vector<1x128xf32>
    %160 = arith.mulf %159, %93 : vector<1x128xf32>
    %161 = arith.addf %158, %160 : vector<1x128xf32>
    %cst_78 = arith.constant -0.79659307 : f32
    %162 = vector.broadcast %cst_78 : f32 to vector<1x128xf32>
    %163 = arith.mulf %162, %70 : vector<1x128xf32>
    %164 = arith.addf %161, %163 : vector<1x128xf32>
    %cst_79 = arith.constant -0.366312772 : f32
    %165 = vector.broadcast %cst_79 : f32 to vector<1x128xf32>
    %166 = arith.mulf %165, %50 : vector<1x128xf32>
    %167 = arith.addf %164, %166 : vector<1x128xf32>
    %cst_80 = arith.constant -0.161710724 : f32
    %168 = vector.broadcast %cst_80 : f32 to vector<1x128xf32>
    %169 = arith.mulf %168, %33 : vector<1x128xf32>
    %170 = arith.addf %167, %169 : vector<1x128xf32>
    %cst_81 = arith.constant -0.069405064 : f32
    %171 = vector.broadcast %cst_81 : f32 to vector<1x128xf32>
    %172 = arith.mulf %171, %19 : vector<1x128xf32>
    %173 = arith.addf %170, %172 : vector<1x128xf32>
    %cst_82 = arith.constant -0.0291802231 : f32
    %174 = vector.broadcast %cst_82 : f32 to vector<1x128xf32>
    %175 = arith.mulf %174, %8 : vector<1x128xf32>
    %176 = arith.addf %173, %175 : vector<1x128xf32>
    %cst_83 = arith.constant 1.000000e+00 : f32
    %177 = vector.broadcast %cst_83 : f32 to vector<1x128xf32>
    %178 = arith.cmpf oge, %176, %177 : vector<1x128xf32>
    %179 = arith.extui %178 : vector<1x128xi1> to vector<1x128xi32>
    %180 = arith.sitofp %179 : vector<1x128xi32> to vector<1x128xf32>
    %cst_84 = arith.constant 1.000000e+00 : f32
    %181 = vector.broadcast %cst_84 : f32 to vector<1x128xf32>
    %182 = arith.mulf %180, %181 : vector<1x128xf32>
    %c8_85 = arith.constant 8 : index
    %c0_86 = arith.constant 0 : index
    %183 = vector.load %arg6[%c8_85, %c0_86] : memref<16x128xf32, #tpu.memory_space<vmem>>, vector<1x128xf32>
    tpu.vector_store %arg6[%c8_85, %c0_86], %182 {strides = array<i32>} : memref<16x128xf32, #tpu.memory_space<vmem>>, vector<1x128xf32>,
    %c9 = arith.constant 9 : index
    %c0_87 = arith.constant 0 : index
    %184 = vector.load %arg5[%c9, %c0_87] : memref<16x128xf32, #tpu.memory_space<vmem>>, vector<1x128xf32>
    %cst_88 = arith.constant -4.000000e+00 : f32
    %185 = vector.broadcast %cst_88 : f32 to vector<1x128xf32>
    %186 = arith.mulf %185, %180 : vector<1x128xf32>
    %187 = arith.addf %184, %186 : vector<1x128xf32>
    %cst_89 = arith.constant -2.9430356 : f32
    %188 = vector.broadcast %cst_89 : f32 to vector<1x128xf32>
    %189 = arith.mulf %188, %148 : vector<1x128xf32>
    %190 = arith.addf %187, %189 : vector<1x128xf32>
    %cst_90 = arith.constant -1.62402344 : f32
    %191 = vector.broadcast %cst_90 : f32 to vector<1x128xf32>
    %192 = arith.mulf %191, %119 : vector<1x128xf32>
    %193 = arith.addf %190, %192 : vector<1x128xf32>
    %cst_91 = arith.constant -0.79659307 : f32
    %194 = vector.broadcast %cst_91 : f32 to vector<1x128xf32>
    %195 = arith.mulf %194, %93 : vector<1x128xf32>
    %196 = arith.addf %193, %195 : vector<1x128xf32>
    %cst_92 = arith.constant -0.366312772 : f32
    %197 = vector.broadcast %cst_92 : f32 to vector<1x128xf32>
    %198 = arith.mulf %197, %70 : vector<1x128xf32>
    %199 = arith.addf %196, %198 : vector<1x128xf32>
    %cst_93 = arith.constant -0.161710724 : f32
    %200 = vector.broadcast %cst_93 : f32 to vector<1x128xf32>
    %201 = arith.mulf %200, %50 : vector<1x128xf32>
    %202 = arith.addf %199, %201 : vector<1x128xf32>
    %cst_94 = arith.constant -0.069405064 : f32
    %203 = vector.broadcast %cst_94 : f32 to vector<1x128xf32>
    %204 = arith.mulf %203, %33 : vector<1x128xf32>
    %205 = arith.addf %202, %204 : vector<1x128xf32>
    %cst_95 = arith.constant -0.0291802231 : f32
    %206 = vector.broadcast %cst_95 : f32 to vector<1x128xf32>
    %207 = arith.mulf %206, %19 : vector<1x128xf32>
    %208 = arith.addf %205, %207 : vector<1x128xf32>
    %cst_96 = arith.constant -0.0120766545 : f32
    %209 = vector.broadcast %cst_96 : f32 to vector<1x128xf32>
    %210 = arith.mulf %209, %8 : vector<1x128xf32>
    %211 = arith.addf %208, %210 : vector<1x128xf32>
    %cst_97 = arith.constant 1.000000e+00 : f32
    %212 = vector.broadcast %cst_97 : f32 to vector<1x128xf32>
    %213 = arith.cmpf oge, %211, %212 : vector<1x128xf32>
    %214 = arith.extui %213 : vector<1x128xi1> to vector<1x128xi32>
    %215 = arith.sitofp %214 : vector<1x128xi32> to vector<1x128xf32>
    %cst_98 = arith.constant 1.000000e+00 : f32
    %216 = vector.broadcast %cst_98 : f32 to vector<1x128xf32>
    %217 = arith.mulf %215, %216 : vector<1x128xf32>
    %c9_99 = arith.constant 9 : index
    %c0_100 = arith.constant 0 : index
    %218 = vector.load %arg6[%c9_99, %c0_100] : memref<16x128xf32, #tpu.memory_space<vmem>>, vector<1x128xf32>
    tpu.vector_store %arg6[%c9_99, %c0_100], %217 {strides = array<i32>} : memref<16x128xf32, #tpu.memory_space<vmem>>, vector<1x128xf32>,
    %c10 = arith.constant 10 : index
    %c0_101 = arith.constant 0 : index
    %219 = vector.load %arg5[%c10, %c0_101] : memref<16x128xf32, #tpu.memory_space<vmem>>, vector<1x128xf32>
    %cst_102 = arith.constant -4.000000e+00 : f32
    %220 = vector.broadcast %cst_102 : f32 to vector<1x128xf32>
    %221 = arith.mulf %220, %215 : vector<1x128xf32>
    %222 = arith.addf %219, %221 : vector<1x128xf32>
    %cst_103 = arith.constant -2.9430356 : f32
    %223 = vector.broadcast %cst_103 : f32 to vector<1x128xf32>
    %224 = arith.mulf %223, %180 : vector<1x128xf32>
    %225 = arith.addf %222, %224 : vector<1x128xf32>
    %cst_104 = arith.constant -1.62402344 : f32
    %226 = vector.broadcast %cst_104 : f32 to vector<1x128xf32>
    %227 = arith.mulf %226, %148 : vector<1x128xf32>
    %228 = arith.addf %225, %227 : vector<1x128xf32>
    %cst_105 = arith.constant -0.79659307 : f32
    %229 = vector.broadcast %cst_105 : f32 to vector<1x128xf32>
    %230 = arith.mulf %229, %119 : vector<1x128xf32>
    %231 = arith.addf %228, %230 : vector<1x128xf32>
    %cst_106 = arith.constant -0.366312772 : f32
    %232 = vector.broadcast %cst_106 : f32 to vector<1x128xf32>
    %233 = arith.mulf %232, %93 : vector<1x128xf32>
    %234 = arith.addf %231, %233 : vector<1x128xf32>
    %cst_107 = arith.constant -0.161710724 : f32
    %235 = vector.broadcast %cst_107 : f32 to vector<1x128xf32>
    %236 = arith.mulf %235, %70 : vector<1x128xf32>
    %237 = arith.addf %234, %236 : vector<1x128xf32>
    %cst_108 = arith.constant -0.069405064 : f32
    %238 = vector.broadcast %cst_108 : f32 to vector<1x128xf32>
    %239 = arith.mulf %238, %50 : vector<1x128xf32>
    %240 = arith.addf %237, %239 : vector<1x128xf32>
    %cst_109 = arith.constant -0.0291802231 : f32
    %241 = vector.broadcast %cst_109 : f32 to vector<1x128xf32>
    %242 = arith.mulf %241, %33 : vector<1x128xf32>
    %243 = arith.addf %240, %242 : vector<1x128xf32>
    %cst_110 = arith.constant -0.0120766545 : f32
    %244 = vector.broadcast %cst_110 : f32 to vector<1x128xf32>
    %245 = arith.mulf %244, %19 : vector<1x128xf32>
    %246 = arith.addf %243, %245 : vector<1x128xf32>
    %cst_111 = arith.constant 1.000000e+00 : f32
    %247 = vector.broadcast %cst_111 : f32 to vector<1x128xf32>
    %248 = arith.cmpf oge, %246, %247 : vector<1x128xf32>
    %249 = arith.extui %248 : vector<1x128xi1> to vector<1x128xi32>
    %250 = arith.sitofp %249 : vector<1x128xi32> to vector<1x128xf32>
    %cst_112 = arith.constant 1.000000e+00 : f32
    %251 = vector.broadcast %cst_112 : f32 to vector<1x128xf32>
    %252 = arith.mulf %250, %251 : vector<1x128xf32>
    %c10_113 = arith.constant 10 : index
    %c0_114 = arith.constant 0 : index
    %253 = vector.load %arg6[%c10_113, %c0_114] : memref<16x128xf32, #tpu.memory_space<vmem>>, vector<1x128xf32>
    tpu.vector_store %arg6[%c10_113, %c0_114], %252 {strides = array<i32>} : memref<16x128xf32, #tpu.memory_space<vmem>>, vector<1x128xf32>,
    %c11 = arith.constant 11 : index
    %c0_115 = arith.constant 0 : index
    %254 = vector.load %arg5[%c11, %c0_115] : memref<16x128xf32, #tpu.memory_space<vmem>>, vector<1x128xf32>
    %cst_116 = arith.constant -4.000000e+00 : f32
    %255 = vector.broadcast %cst_116 : f32 to vector<1x128xf32>
    %256 = arith.mulf %255, %250 : vector<1x128xf32>
    %257 = arith.addf %254, %256 : vector<1x128xf32>
    %cst_117 = arith.constant -2.9430356 : f32
    %258 = vector.broadcast %cst_117 : f32 to vector<1x128xf32>
    %259 = arith.mulf %258, %215 : vector<1x128xf32>
    %260 = arith.addf %257, %259 : vector<1x128xf32>
    %cst_118 = arith.constant -1.62402344 : f32
    %261 = vector.broadcast %cst_118 : f32 to vector<1x128xf32>
    %262 = arith.mulf %261, %180 : vector<1x128xf32>
    %263 = arith.addf %260, %262 : vector<1x128xf32>
    %cst_119 = arith.constant -0.79659307 : f32
    %264 = vector.broadcast %cst_119 : f32 to vector<1x128xf32>
    %265 = arith.mulf %264, %148 : vector<1x128xf32>
    %266 = arith.addf %263, %265 : vector<1x128xf32>
    %cst_120 = arith.constant -0.366312772 : f32
    %267 = vector.broadcast %cst_120 : f32 to vector<1x128xf32>
    %268 = arith.mulf %267, %119 : vector<1x128xf32>
    %269 = arith.addf %266, %268 : vector<1x128xf32>
    %cst_121 = arith.constant -0.161710724 : f32
    %270 = vector.broadcast %cst_121 : f32 to vector<1x128xf32>
    %271 = arith.mulf %270, %93 : vector<1x128xf32>
    %272 = arith.addf %269, %271 : vector<1x128xf32>
    %cst_122 = arith.constant -0.069405064 : f32
    %273 = vector.broadcast %cst_122 : f32 to vector<1x128xf32>
    %274 = arith.mulf %273, %70 : vector<1x128xf32>
    %275 = arith.addf %272, %274 : vector<1x128xf32>
    %cst_123 = arith.constant -0.0291802231 : f32
    %276 = vector.broadcast %cst_123 : f32 to vector<1x128xf32>
    %277 = arith.mulf %276, %50 : vector<1x128xf32>
    %278 = arith.addf %275, %277 : vector<1x128xf32>
    %cst_124 = arith.constant -0.0120766545 : f32
    %279 = vector.broadcast %cst_124 : f32 to vector<1x128xf32>
    %280 = arith.mulf %279, %33 : vector<1x128xf32>
    %281 = arith.addf %278, %280 : vector<1x128xf32>
    %cst_125 = arith.constant 1.000000e+00 : f32
    %282 = vector.broadcast %cst_125 : f32 to vector<1x128xf32>
    %283 = arith.cmpf oge, %281, %282 : vector<1x128xf32>
    %284 = arith.extui %283 : vector<1x128xi1> to vector<1x128xi32>
    %285 = arith.sitofp %284 : vector<1x128xi32> to vector<1x128xf32>
    %cst_126 = arith.constant 1.000000e+00 : f32
    %286 = vector.broadcast %cst_126 : f32 to vector<1x128xf32>
    %287 = arith.mulf %285, %286 : vector<1x128xf32>
    %c11_127 = arith.constant 11 : index
    %c0_128 = arith.constant 0 : index
    %288 = vector.load %arg6[%c11_127, %c0_128] : memref<16x128xf32, #tpu.memory_space<vmem>>, vector<1x128xf32>
    tpu.vector_store %arg6[%c11_127, %c0_128], %287 {strides = array<i32>} : memref<16x128xf32, #tpu.memory_space<vmem>>, vector<1x128xf32>,
    %c12 = arith.constant 12 : index
    %c0_129 = arith.constant 0 : index
    %289 = vector.load %arg5[%c12, %c0_129] : memref<16x128xf32, #tpu.memory_space<vmem>>, vector<1x128xf32>
    %cst_130 = arith.constant -4.000000e+00 : f32
    %290 = vector.broadcast %cst_130 : f32 to vector<1x128xf32>
    %291 = arith.mulf %290, %285 : vector<1x128xf32>
    %292 = arith.addf %289, %291 : vector<1x128xf32>
    %cst_131 = arith.constant -2.9430356 : f32
    %293 = vector.broadcast %cst_131 : f32 to vector<1x128xf32>
    %294 = arith.mulf %293, %250 : vector<1x128xf32>
    %295 = arith.addf %292, %294 : vector<1x128xf32>
    %cst_132 = arith.constant -1.62402344 : f32
    %296 = vector.broadcast %cst_132 : f32 to vector<1x128xf32>
    %297 = arith.mulf %296, %215 : vector<1x128xf32>
    %298 = arith.addf %295, %297 : vector<1x128xf32>
    %cst_133 = arith.constant -0.79659307 : f32
    %299 = vector.broadcast %cst_133 : f32 to vector<1x128xf32>
    %300 = arith.mulf %299, %180 : vector<1x128xf32>
    %301 = arith.addf %298, %300 : vector<1x128xf32>
    %cst_134 = arith.constant -0.366312772 : f32
    %302 = vector.broadcast %cst_134 : f32 to vector<1x128xf32>
    %303 = arith.mulf %302, %148 : vector<1x128xf32>
    %304 = arith.addf %301, %303 : vector<1x128xf32>
    %cst_135 = arith.constant -0.161710724 : f32
    %305 = vector.broadcast %cst_135 : f32 to vector<1x128xf32>
    %306 = arith.mulf %305, %119 : vector<1x128xf32>
    %307 = arith.addf %304, %306 : vector<1x128xf32>
    %cst_136 = arith.constant -0.069405064 : f32
    %308 = vector.broadcast %cst_136 : f32 to vector<1x128xf32>
    %309 = arith.mulf %308, %93 : vector<1x128xf32>
    %310 = arith.addf %307, %309 : vector<1x128xf32>
    %cst_137 = arith.constant -0.0291802231 : f32
    %311 = vector.broadcast %cst_137 : f32 to vector<1x128xf32>
    %312 = arith.mulf %311, %70 : vector<1x128xf32>
    %313 = arith.addf %310, %312 : vector<1x128xf32>
    %cst_138 = arith.constant -0.0120766545 : f32
    %314 = vector.broadcast %cst_138 : f32 to vector<1x128xf32>
    %315 = arith.mulf %314, %50 : vector<1x128xf32>
    %316 = arith.addf %313, %315 : vector<1x128xf32>
    %cst_139 = arith.constant 1.000000e+00 : f32
    %317 = vector.broadcast %cst_139 : f32 to vector<1x128xf32>
    %318 = arith.cmpf oge, %316, %317 : vector<1x128xf32>
    %319 = arith.extui %318 : vector<1x128xi1> to vector<1x128xi32>
    %320 = arith.sitofp %319 : vector<1x128xi32> to vector<1x128xf32>
    %cst_140 = arith.constant 1.000000e+00 : f32
    %321 = vector.broadcast %cst_140 : f32 to vector<1x128xf32>
    %322 = arith.mulf %320, %321 : vector<1x128xf32>
    %c12_141 = arith.constant 12 : index
    %c0_142 = arith.constant 0 : index
    %323 = vector.load %arg6[%c12_141, %c0_142] : memref<16x128xf32, #tpu.memory_space<vmem>>, vector<1x128xf32>
    tpu.vector_store %arg6[%c12_141, %c0_142], %322 {strides = array<i32>} : memref<16x128xf32, #tpu.memory_space<vmem>>, vector<1x128xf32>,
    %c13 = arith.constant 13 : index
    %c0_143 = arith.constant 0 : index
    %324 = vector.load %arg5[%c13, %c0_143] : memref<16x128xf32, #tpu.memory_space<vmem>>, vector<1x128xf32>
    %cst_144 = arith.constant -4.000000e+00 : f32
    %325 = vector.broadcast %cst_144 : f32 to vector<1x128xf32>
    %326 = arith.mulf %325, %320 : vector<1x128xf32>
    %327 = arith.addf %324, %326 : vector<1x128xf32>
    %cst_145 = arith.constant -2.9430356 : f32
    %328 = vector.broadcast %cst_145 : f32 to vector<1x128xf32>
    %329 = arith.mulf %328, %285 : vector<1x128xf32>
    %330 = arith.addf %327, %329 : vector<1x128xf32>
    %cst_146 = arith.constant -1.62402344 : f32
    %331 = vector.broadcast %cst_146 : f32 to vector<1x128xf32>
    %332 = arith.mulf %331, %250 : vector<1x128xf32>
    %333 = arith.addf %330, %332 : vector<1x128xf32>
    %cst_147 = arith.constant -0.79659307 : f32
    %334 = vector.broadcast %cst_147 : f32 to vector<1x128xf32>
    %335 = arith.mulf %334, %215 : vector<1x128xf32>
    %336 = arith.addf %333, %335 : vector<1x128xf32>
    %cst_148 = arith.constant -0.366312772 : f32
    %337 = vector.broadcast %cst_148 : f32 to vector<1x128xf32>
    %338 = arith.mulf %337, %180 : vector<1x128xf32>
    %339 = arith.addf %336, %338 : vector<1x128xf32>
    %cst_149 = arith.constant -0.161710724 : f32
    %340 = vector.broadcast %cst_149 : f32 to vector<1x128xf32>
    %341 = arith.mulf %340, %148 : vector<1x128xf32>
    %342 = arith.addf %339, %341 : vector<1x128xf32>
    %cst_150 = arith.constant -0.069405064 : f32
    %343 = vector.broadcast %cst_150 : f32 to vector<1x128xf32>
    %344 = arith.mulf %343, %119 : vector<1x128xf32>
    %345 = arith.addf %342, %344 : vector<1x128xf32>
    %cst_151 = arith.constant -0.0291802231 : f32
    %346 = vector.broadcast %cst_151 : f32 to vector<1x128xf32>
    %347 = arith.mulf %346, %93 : vector<1x128xf32>
    %348 = arith.addf %345, %347 : vector<1x128xf32>
    %cst_152 = arith.constant -0.0120766545 : f32
    %349 = vector.broadcast %cst_152 : f32 to vector<1x128xf32>
    %350 = arith.mulf %349, %70 : vector<1x128xf32>
    %351 = arith.addf %348, %350 : vector<1x128xf32>
    %cst_153 = arith.constant 1.000000e+00 : f32
    %352 = vector.broadcast %cst_153 : f32 to vector<1x128xf32>
    %353 = arith.cmpf oge, %351, %352 : vector<1x128xf32>
    %354 = arith.extui %353 : vector<1x128xi1> to vector<1x128xi32>
    %355 = arith.sitofp %354 : vector<1x128xi32> to vector<1x128xf32>
    %cst_154 = arith.constant 1.000000e+00 : f32
    %356 = vector.broadcast %cst_154 : f32 to vector<1x128xf32>
    %357 = arith.mulf %355, %356 : vector<1x128xf32>
    %c13_155 = arith.constant 13 : index
    %c0_156 = arith.constant 0 : index
    %358 = vector.load %arg6[%c13_155, %c0_156] : memref<16x128xf32, #tpu.memory_space<vmem>>, vector<1x128xf32>
    tpu.vector_store %arg6[%c13_155, %c0_156], %357 {strides = array<i32>} : memref<16x128xf32, #tpu.memory_space<vmem>>, vector<1x128xf32>,
    %c14 = arith.constant 14 : index
    %c0_157 = arith.constant 0 : index
    %359 = vector.load %arg5[%c14, %c0_157] : memref<16x128xf32, #tpu.memory_space<vmem>>, vector<1x128xf32>
    %cst_158 = arith.constant -4.000000e+00 : f32
    %360 = vector.broadcast %cst_158 : f32 to vector<1x128xf32>
    %361 = arith.mulf %360, %355 : vector<1x128xf32>
    %362 = arith.addf %359, %361 : vector<1x128xf32>
    %cst_159 = arith.constant -2.9430356 : f32
    %363 = vector.broadcast %cst_159 : f32 to vector<1x128xf32>
    %364 = arith.mulf %363, %320 : vector<1x128xf32>
    %365 = arith.addf %362, %364 : vector<1x128xf32>
    %cst_160 = arith.constant -1.62402344 : f32
    %366 = vector.broadcast %cst_160 : f32 to vector<1x128xf32>
    %367 = arith.mulf %366, %285 : vector<1x128xf32>
    %368 = arith.addf %365, %367 : vector<1x128xf32>
    %cst_161 = arith.constant -0.79659307 : f32
    %369 = vector.broadcast %cst_161 : f32 to vector<1x128xf32>
    %370 = arith.mulf %369, %250 : vector<1x128xf32>
    %371 = arith.addf %368, %370 : vector<1x128xf32>
    %cst_162 = arith.constant -0.366312772 : f32
    %372 = vector.broadcast %cst_162 : f32 to vector<1x128xf32>
    %373 = arith.mulf %372, %215 : vector<1x128xf32>
    %374 = arith.addf %371, %373 : vector<1x128xf32>
    %cst_163 = arith.constant -0.161710724 : f32
    %375 = vector.broadcast %cst_163 : f32 to vector<1x128xf32>
    %376 = arith.mulf %375, %180 : vector<1x128xf32>
    %377 = arith.addf %374, %376 : vector<1x128xf32>
    %cst_164 = arith.constant -0.069405064 : f32
    %378 = vector.broadcast %cst_164 : f32 to vector<1x128xf32>
    %379 = arith.mulf %378, %148 : vector<1x128xf32>
    %380 = arith.addf %377, %379 : vector<1x128xf32>
    %cst_165 = arith.constant -0.0291802231 : f32
    %381 = vector.broadcast %cst_165 : f32 to vector<1x128xf32>
    %382 = arith.mulf %381, %119 : vector<1x128xf32>
    %383 = arith.addf %380, %382 : vector<1x128xf32>
    %cst_166 = arith.constant -0.0120766545 : f32
    %384 = vector.broadcast %cst_166 : f32 to vector<1x128xf32>
    %385 = arith.mulf %384, %93 : vector<1x128xf32>
    %386 = arith.addf %383, %385 : vector<1x128xf32>
    %cst_167 = arith.constant 1.000000e+00 : f32
    %387 = vector.broadcast %cst_167 : f32 to vector<1x128xf32>
    %388 = arith.cmpf oge, %386, %387 : vector<1x128xf32>
    %389 = arith.extui %388 : vector<1x128xi1> to vector<1x128xi32>
    %390 = arith.sitofp %389 : vector<1x128xi32> to vector<1x128xf32>
    %cst_168 = arith.constant 1.000000e+00 : f32
    %391 = vector.broadcast %cst_168 : f32 to vector<1x128xf32>
    %392 = arith.mulf %390, %391 : vector<1x128xf32>
    %c14_169 = arith.constant 14 : index
    %c0_170 = arith.constant 0 : index
    %393 = vector.load %arg6[%c14_169, %c0_170] : memref<16x128xf32, #tpu.memory_space<vmem>>, vector<1x128xf32>
    tpu.vector_store %arg6[%c14_169, %c0_170], %392 {strides = array<i32>} : memref<16x128xf32, #tpu.memory_space<vmem>>, vector<1x128xf32>,
    %c15 = arith.constant 15 : index
    %c0_171 = arith.constant 0 : index
    %394 = vector.load %arg5[%c15, %c0_171] : memref<16x128xf32, #tpu.memory_space<vmem>>, vector<1x128xf32>
    %cst_172 = arith.constant -4.000000e+00 : f32
    %395 = vector.broadcast %cst_172 : f32 to vector<1x128xf32>
    %396 = arith.mulf %395, %390 : vector<1x128xf32>
    %397 = arith.addf %394, %396 : vector<1x128xf32>
    %cst_173 = arith.constant -2.9430356 : f32
    %398 = vector.broadcast %cst_173 : f32 to vector<1x128xf32>
    %399 = arith.mulf %398, %355 : vector<1x128xf32>
    %400 = arith.addf %397, %399 : vector<1x128xf32>
    %cst_174 = arith.constant -1.62402344 : f32
    %401 = vector.broadcast %cst_174 : f32 to vector<1x128xf32>
    %402 = arith.mulf %401, %320 : vector<1x128xf32>
    %403 = arith.addf %400, %402 : vector<1x128xf32>
    %cst_175 = arith.constant -0.79659307 : f32
    %404 = vector.broadcast %cst_175 : f32 to vector<1x128xf32>
    %405 = arith.mulf %404, %285 : vector<1x128xf32>
    %406 = arith.addf %403, %405 : vector<1x128xf32>
    %cst_176 = arith.constant -0.366312772 : f32
    %407 = vector.broadcast %cst_176 : f32 to vector<1x128xf32>
    %408 = arith.mulf %407, %250 : vector<1x128xf32>
    %409 = arith.addf %406, %408 : vector<1x128xf32>
    %cst_177 = arith.constant -0.161710724 : f32
    %410 = vector.broadcast %cst_177 : f32 to vector<1x128xf32>
    %411 = arith.mulf %410, %215 : vector<1x128xf32>
    %412 = arith.addf %409, %411 : vector<1x128xf32>
    %cst_178 = arith.constant -0.069405064 : f32
    %413 = vector.broadcast %cst_178 : f32 to vector<1x128xf32>
    %414 = arith.mulf %413, %180 : vector<1x128xf32>
    %415 = arith.addf %412, %414 : vector<1x128xf32>
    %cst_179 = arith.constant -0.0291802231 : f32
    %416 = vector.broadcast %cst_179 : f32 to vector<1x128xf32>
    %417 = arith.mulf %416, %148 : vector<1x128xf32>
    %418 = arith.addf %415, %417 : vector<1x128xf32>
    %cst_180 = arith.constant -0.0120766545 : f32
    %419 = vector.broadcast %cst_180 : f32 to vector<1x128xf32>
    %420 = arith.mulf %419, %119 : vector<1x128xf32>
    %421 = arith.addf %418, %420 : vector<1x128xf32>
    %cst_181 = arith.constant 1.000000e+00 : f32
    %422 = vector.broadcast %cst_181 : f32 to vector<1x128xf32>
    %423 = arith.cmpf oge, %421, %422 : vector<1x128xf32>
    %424 = arith.extui %423 : vector<1x128xi1> to vector<1x128xi32>
    %425 = arith.sitofp %424 : vector<1x128xi32> to vector<1x128xf32>
    %cst_182 = arith.constant 1.000000e+00 : f32
    %426 = vector.broadcast %cst_182 : f32 to vector<1x128xf32>
    %427 = arith.mulf %425, %426 : vector<1x128xf32>
    %c15_183 = arith.constant 15 : index
    %c0_184 = arith.constant 0 : index
    %428 = vector.load %arg6[%c15_183, %c0_184] : memref<16x128xf32, #tpu.memory_space<vmem>>, vector<1x128xf32>
    tpu.vector_store %arg6[%c15_183, %c0_184], %427 {strides = array<i32>} : memref<16x128xf32, #tpu.memory_space<vmem>>, vector<1x128xf32>,
    %c0_185 = arith.constant 0 : index
    %c0_186 = arith.constant 0 : index
    %429 = vector.load %arg6[%c0_185, %c0_186] : memref<16x128xf32, #tpu.memory_space<vmem>>, vector<16x128xf32>
    %c0_187 = arith.constant 0 : index
    %c0_188 = arith.constant 0 : index
    %430 = vector.load %arg2[%c0_187, %c0_188] : memref<128x128xf32, #tpu.memory_space<vmem>>, vector<128x128xf32>
    %cst_189 = arith.constant dense<0.000000e+00> : vector<16x128xf32>
    %431 = tpu.matmul %429, %430, %cst_189 {dimension_numbers = #tpu.dot_dimension_numbers<[1], [0], [0], [1], [0, 0, 1, 1], [], []>} : vector<16x128xf32>, vector<128x128xf32>, vector<16x128xf32> -> vector<16x128xf32>
    %c0_190 = arith.constant 0 : index
    %c0_191 = arith.constant 0 : index
    %432 = vector.load %arg3[%c0_190, %c0_191] : memref<16x16xf32, #tpu.memory_space<vmem>>, vector<16x16xf32>
    %cst_192 = arith.constant dense<0.000000e+00> : vector<16x128xf32>
    %433 = tpu.matmul %432, %431, %cst_192 {dimension_numbers = #tpu.dot_dimension_numbers<[1], [0], [0], [1], [0, 0, 1, 1], [], []>} : vector<16x16xf32>, vector<16x128xf32>, vector<16x128xf32> -> vector<16x128xf32>
    %c0_193 = arith.constant 0 : index
    %c0_194 = arith.constant 0 : index
    %434 = vector.load %arg7[%c0_193, %c0_194] : memref<16x128xf32, #tpu.memory_space<vmem>>, vector<16x128xf32>
    tpu.vector_store %arg7[%c0_193, %c0_194], %433 {strides = array<i32>} : memref<16x128xf32, #tpu.memory_space<vmem>>, vector<16x128xf32>,
    %c0_195 = arith.constant 0 : index
    %c0_196 = arith.constant 0 : index
    %435 = vector.load %arg7[%c0_195, %c0_196] : memref<16x128xf32, #tpu.memory_space<vmem>>, vector<1x128xf32>
    %cst_197 = arith.constant 1.000000e+00 : f32
    %436 = vector.broadcast %cst_197 : f32 to vector<1x128xf32>
    %437 = arith.cmpf oge, %435, %436 : vector<1x128xf32>
    %438 = arith.extui %437 : vector<1x128xi1> to vector<1x128xi32>
    %439 = arith.sitofp %438 : vector<1x128xi32> to vector<1x128xf32>
    %cst_198 = arith.constant 1.000000e+00 : f32
    %440 = vector.broadcast %cst_198 : f32 to vector<1x128xf32>
    %441 = arith.mulf %439, %440 : vector<1x128xf32>
    %c0_199 = arith.constant 0 : index
    %c0_200 = arith.constant 0 : index
    %442 = vector.load %arg4[%c0_199, %c0_200] : memref<16x128xf32, #tpu.memory_space<vmem>>, vector<1x128xf32>
    tpu.vector_store %arg4[%c0_199, %c0_200], %441 {strides = array<i32>} : memref<16x128xf32, #tpu.memory_space<vmem>>, vector<1x128xf32>,
    %c1_201 = arith.constant 1 : index
    %c0_202 = arith.constant 0 : index
    %443 = vector.load %arg7[%c1_201, %c0_202] : memref<16x128xf32, #tpu.memory_space<vmem>>, vector<1x128xf32>
    %cst_203 = arith.constant -4.000000e+00 : f32
    %444 = vector.broadcast %cst_203 : f32 to vector<1x128xf32>
    %445 = arith.mulf %444, %439 : vector<1x128xf32>
    %446 = arith.addf %443, %445 : vector<1x128xf32>
    %cst_204 = arith.constant 1.000000e+00 : f32
    %447 = vector.broadcast %cst_204 : f32 to vector<1x128xf32>
    %448 = arith.cmpf oge, %446, %447 : vector<1x128xf32>
    %449 = arith.extui %448 : vector<1x128xi1> to vector<1x128xi32>
    %450 = arith.sitofp %449 : vector<1x128xi32> to vector<1x128xf32>
    %cst_205 = arith.constant 1.000000e+00 : f32
    %451 = vector.broadcast %cst_205 : f32 to vector<1x128xf32>
    %452 = arith.mulf %450, %451 : vector<1x128xf32>
    %c1_206 = arith.constant 1 : index
    %c0_207 = arith.constant 0 : index
    %453 = vector.load %arg4[%c1_206, %c0_207] : memref<16x128xf32, #tpu.memory_space<vmem>>, vector<1x128xf32>
    tpu.vector_store %arg4[%c1_206, %c0_207], %452 {strides = array<i32>} : memref<16x128xf32, #tpu.memory_space<vmem>>, vector<1x128xf32>,
    %c2_208 = arith.constant 2 : index
    %c0_209 = arith.constant 0 : index
    %454 = vector.load %arg7[%c2_208, %c0_209] : memref<16x128xf32, #tpu.memory_space<vmem>>, vector<1x128xf32>
    %cst_210 = arith.constant -4.000000e+00 : f32
    %455 = vector.broadcast %cst_210 : f32 to vector<1x128xf32>
    %456 = arith.mulf %455, %450 : vector<1x128xf32>
    %457 = arith.addf %454, %456 : vector<1x128xf32>
    %cst_211 = arith.constant -2.9430356 : f32
    %458 = vector.broadcast %cst_211 : f32 to vector<1x128xf32>
    %459 = arith.mulf %458, %439 : vector<1x128xf32>
    %460 = arith.addf %457, %459 : vector<1x128xf32>
    %cst_212 = arith.constant 1.000000e+00 : f32
    %461 = vector.broadcast %cst_212 : f32 to vector<1x128xf32>
    %462 = arith.cmpf oge, %460, %461 : vector<1x128xf32>
    %463 = arith.extui %462 : vector<1x128xi1> to vector<1x128xi32>
    %464 = arith.sitofp %463 : vector<1x128xi32> to vector<1x128xf32>
    %cst_213 = arith.constant 1.000000e+00 : f32
    %465 = vector.broadcast %cst_213 : f32 to vector<1x128xf32>
    %466 = arith.mulf %464, %465 : vector<1x128xf32>
    %c2_214 = arith.constant 2 : index
    %c0_215 = arith.constant 0 : index
    %467 = vector.load %arg4[%c2_214, %c0_215] : memref<16x128xf32, #tpu.memory_space<vmem>>, vector<1x128xf32>
    tpu.vector_store %arg4[%c2_214, %c0_215], %466 {strides = array<i32>} : memref<16x128xf32, #tpu.memory_space<vmem>>, vector<1x128xf32>,
    %c3_216 = arith.constant 3 : index
    %c0_217 = arith.constant 0 : index
    %468 = vector.load %arg7[%c3_216, %c0_217] : memref<16x128xf32, #tpu.memory_space<vmem>>, vector<1x128xf32>
    %cst_218 = arith.constant -4.000000e+00 : f32
    %469 = vector.broadcast %cst_218 : f32 to vector<1x128xf32>
    %470 = arith.mulf %469, %464 : vector<1x128xf32>
    %471 = arith.addf %468, %470 : vector<1x128xf32>
    %cst_219 = arith.constant -2.9430356 : f32
    %472 = vector.broadcast %cst_219 : f32 to vector<1x128xf32>
    %473 = arith.mulf %472, %450 : vector<1x128xf32>
    %474 = arith.addf %471, %473 : vector<1x128xf32>
    %cst_220 = arith.constant -1.62402344 : f32
    %475 = vector.broadcast %cst_220 : f32 to vector<1x128xf32>
    %476 = arith.mulf %475, %439 : vector<1x128xf32>
    %477 = arith.addf %474, %476 : vector<1x128xf32>
    %cst_221 = arith.constant 1.000000e+00 : f32
    %478 = vector.broadcast %cst_221 : f32 to vector<1x128xf32>
    %479 = arith.cmpf oge, %477, %478 : vector<1x128xf32>
    %480 = arith.extui %479 : vector<1x128xi1> to vector<1x128xi32>
    %481 = arith.sitofp %480 : vector<1x128xi32> to vector<1x128xf32>
    %cst_222 = arith.constant 1.000000e+00 : f32
    %482 = vector.broadcast %cst_222 : f32 to vector<1x128xf32>
    %483 = arith.mulf %481, %482 : vector<1x128xf32>
    %c3_223 = arith.constant 3 : index
    %c0_224 = arith.constant 0 : index
    %484 = vector.load %arg4[%c3_223, %c0_224] : memref<16x128xf32, #tpu.memory_space<vmem>>, vector<1x128xf32>
    tpu.vector_store %arg4[%c3_223, %c0_224], %483 {strides = array<i32>} : memref<16x128xf32, #tpu.memory_space<vmem>>, vector<1x128xf32>,
    %c4_225 = arith.constant 4 : index
    %c0_226 = arith.constant 0 : index
    %485 = vector.load %arg7[%c4_225, %c0_226] : memref<16x128xf32, #tpu.memory_space<vmem>>, vector<1x128xf32>
    %cst_227 = arith.constant -4.000000e+00 : f32
    %486 = vector.broadcast %cst_227 : f32 to vector<1x128xf32>
    %487 = arith.mulf %486, %481 : vector<1x128xf32>
    %488 = arith.addf %485, %487 : vector<1x128xf32>
    %cst_228 = arith.constant -2.9430356 : f32
    %489 = vector.broadcast %cst_228 : f32 to vector<1x128xf32>
    %490 = arith.mulf %489, %464 : vector<1x128xf32>
    %491 = arith.addf %488, %490 : vector<1x128xf32>
    %cst_229 = arith.constant -1.62402344 : f32
    %492 = vector.broadcast %cst_229 : f32 to vector<1x128xf32>
    %493 = arith.mulf %492, %450 : vector<1x128xf32>
    %494 = arith.addf %491, %493 : vector<1x128xf32>
    %cst_230 = arith.constant -0.79659307 : f32
    %495 = vector.broadcast %cst_230 : f32 to vector<1x128xf32>
    %496 = arith.mulf %495, %439 : vector<1x128xf32>
    %497 = arith.addf %494, %496 : vector<1x128xf32>
    %cst_231 = arith.constant 1.000000e+00 : f32
    %498 = vector.broadcast %cst_231 : f32 to vector<1x128xf32>
    %499 = arith.cmpf oge, %497, %498 : vector<1x128xf32>
    %500 = arith.extui %499 : vector<1x128xi1> to vector<1x128xi32>
    %501 = arith.sitofp %500 : vector<1x128xi32> to vector<1x128xf32>
    %cst_232 = arith.constant 1.000000e+00 : f32
    %502 = vector.broadcast %cst_232 : f32 to vector<1x128xf32>
    %503 = arith.mulf %501, %502 : vector<1x128xf32>
    %c4_233 = arith.constant 4 : index
    %c0_234 = arith.constant 0 : index
    %504 = vector.load %arg4[%c4_233, %c0_234] : memref<16x128xf32, #tpu.memory_space<vmem>>, vector<1x128xf32>
    tpu.vector_store %arg4[%c4_233, %c0_234], %503 {strides = array<i32>} : memref<16x128xf32, #tpu.memory_space<vmem>>, vector<1x128xf32>,
    %c5_235 = arith.constant 5 : index
    %c0_236 = arith.constant 0 : index
    %505 = vector.load %arg7[%c5_235, %c0_236] : memref<16x128xf32, #tpu.memory_space<vmem>>, vector<1x128xf32>
    %cst_237 = arith.constant -4.000000e+00 : f32
    %506 = vector.broadcast %cst_237 : f32 to vector<1x128xf32>
    %507 = arith.mulf %506, %501 : vector<1x128xf32>
    %508 = arith.addf %505, %507 : vector<1x128xf32>
    %cst_238 = arith.constant -2.9430356 : f32
    %509 = vector.broadcast %cst_238 : f32 to vector<1x128xf32>
    %510 = arith.mulf %509, %481 : vector<1x128xf32>
    %511 = arith.addf %508, %510 : vector<1x128xf32>
    %cst_239 = arith.constant -1.62402344 : f32
    %512 = vector.broadcast %cst_239 : f32 to vector<1x128xf32>
    %513 = arith.mulf %512, %464 : vector<1x128xf32>
    %514 = arith.addf %511, %513 : vector<1x128xf32>
    %cst_240 = arith.constant -0.79659307 : f32
    %515 = vector.broadcast %cst_240 : f32 to vector<1x128xf32>
    %516 = arith.mulf %515, %450 : vector<1x128xf32>
    %517 = arith.addf %514, %516 : vector<1x128xf32>
    %cst_241 = arith.constant -0.366312772 : f32
    %518 = vector.broadcast %cst_241 : f32 to vector<1x128xf32>
    %519 = arith.mulf %518, %439 : vector<1x128xf32>
    %520 = arith.addf %517, %519 : vector<1x128xf32>
    %cst_242 = arith.constant 1.000000e+00 : f32
    %521 = vector.broadcast %cst_242 : f32 to vector<1x128xf32>
    %522 = arith.cmpf oge, %520, %521 : vector<1x128xf32>
    %523 = arith.extui %522 : vector<1x128xi1> to vector<1x128xi32>
    %524 = arith.sitofp %523 : vector<1x128xi32> to vector<1x128xf32>
    %cst_243 = arith.constant 1.000000e+00 : f32
    %525 = vector.broadcast %cst_243 : f32 to vector<1x128xf32>
    %526 = arith.mulf %524, %525 : vector<1x128xf32>
    %c5_244 = arith.constant 5 : index
    %c0_245 = arith.constant 0 : index
    %527 = vector.load %arg4[%c5_244, %c0_245] : memref<16x128xf32, #tpu.memory_space<vmem>>, vector<1x128xf32>
    tpu.vector_store %arg4[%c5_244, %c0_245], %526 {strides = array<i32>} : memref<16x128xf32, #tpu.memory_space<vmem>>, vector<1x128xf32>,
    %c6_246 = arith.constant 6 : index
    %c0_247 = arith.constant 0 : index
    %528 = vector.load %arg7[%c6_246, %c0_247] : memref<16x128xf32, #tpu.memory_space<vmem>>, vector<1x128xf32>
    %cst_248 = arith.constant -4.000000e+00 : f32
    %529 = vector.broadcast %cst_248 : f32 to vector<1x128xf32>
    %530 = arith.mulf %529, %524 : vector<1x128xf32>
    %531 = arith.addf %528, %530 : vector<1x128xf32>
    %cst_249 = arith.constant -2.9430356 : f32
    %532 = vector.broadcast %cst_249 : f32 to vector<1x128xf32>
    %533 = arith.mulf %532, %501 : vector<1x128xf32>
    %534 = arith.addf %531, %533 : vector<1x128xf32>
    %cst_250 = arith.constant -1.62402344 : f32
    %535 = vector.broadcast %cst_250 : f32 to vector<1x128xf32>
    %536 = arith.mulf %535, %481 : vector<1x128xf32>
    %537 = arith.addf %534, %536 : vector<1x128xf32>
    %cst_251 = arith.constant -0.79659307 : f32
    %538 = vector.broadcast %cst_251 : f32 to vector<1x128xf32>
    %539 = arith.mulf %538, %464 : vector<1x128xf32>
    %540 = arith.addf %537, %539 : vector<1x128xf32>
    %cst_252 = arith.constant -0.366312772 : f32
    %541 = vector.broadcast %cst_252 : f32 to vector<1x128xf32>
    %542 = arith.mulf %541, %450 : vector<1x128xf32>
    %543 = arith.addf %540, %542 : vector<1x128xf32>
    %cst_253 = arith.constant -0.161710724 : f32
    %544 = vector.broadcast %cst_253 : f32 to vector<1x128xf32>
    %545 = arith.mulf %544, %439 : vector<1x128xf32>
    %546 = arith.addf %543, %545 : vector<1x128xf32>
    %cst_254 = arith.constant 1.000000e+00 : f32
    %547 = vector.broadcast %cst_254 : f32 to vector<1x128xf32>
    %548 = arith.cmpf oge, %546, %547 : vector<1x128xf32>
    %549 = arith.extui %548 : vector<1x128xi1> to vector<1x128xi32>
    %550 = arith.sitofp %549 : vector<1x128xi32> to vector<1x128xf32>
    %cst_255 = arith.constant 1.000000e+00 : f32
    %551 = vector.broadcast %cst_255 : f32 to vector<1x128xf32>
    %552 = arith.mulf %550, %551 : vector<1x128xf32>
    %c6_256 = arith.constant 6 : index
    %c0_257 = arith.constant 0 : index
    %553 = vector.load %arg4[%c6_256, %c0_257] : memref<16x128xf32, #tpu.memory_space<vmem>>, vector<1x128xf32>
    tpu.vector_store %arg4[%c6_256, %c0_257], %552 {strides = array<i32>} : memref<16x128xf32, #tpu.memory_space<vmem>>, vector<1x128xf32>,
    %c7_258 = arith.constant 7 : index
    %c0_259 = arith.constant 0 : index
    %554 = vector.load %arg7[%c7_258, %c0_259] : memref<16x128xf32, #tpu.memory_space<vmem>>, vector<1x128xf32>
    %cst_260 = arith.constant -4.000000e+00 : f32
    %555 = vector.broadcast %cst_260 : f32 to vector<1x128xf32>
    %556 = arith.mulf %555, %550 : vector<1x128xf32>
    %557 = arith.addf %554, %556 : vector<1x128xf32>
    %cst_261 = arith.constant -2.9430356 : f32
    %558 = vector.broadcast %cst_261 : f32 to vector<1x128xf32>
    %559 = arith.mulf %558, %524 : vector<1x128xf32>
    %560 = arith.addf %557, %559 : vector<1x128xf32>
    %cst_262 = arith.constant -1.62402344 : f32
    %561 = vector.broadcast %cst_262 : f32 to vector<1x128xf32>
    %562 = arith.mulf %561, %501 : vector<1x128xf32>
    %563 = arith.addf %560, %562 : vector<1x128xf32>
    %cst_263 = arith.constant -0.79659307 : f32
    %564 = vector.broadcast %cst_263 : f32 to vector<1x128xf32>
    %565 = arith.mulf %564, %481 : vector<1x128xf32>
    %566 = arith.addf %563, %565 : vector<1x128xf32>
    %cst_264 = arith.constant -0.366312772 : f32
    %567 = vector.broadcast %cst_264 : f32 to vector<1x128xf32>
    %568 = arith.mulf %567, %464 : vector<1x128xf32>
    %569 = arith.addf %566, %568 : vector<1x128xf32>
    %cst_265 = arith.constant -0.161710724 : f32
    %570 = vector.broadcast %cst_265 : f32 to vector<1x128xf32>
    %571 = arith.mulf %570, %450 : vector<1x128xf32>
    %572 = arith.addf %569, %571 : vector<1x128xf32>
    %cst_266 = arith.constant -0.069405064 : f32
    %573 = vector.broadcast %cst_266 : f32 to vector<1x128xf32>
    %574 = arith.mulf %573, %439 : vector<1x128xf32>
    %575 = arith.addf %572, %574 : vector<1x128xf32>
    %cst_267 = arith.constant 1.000000e+00 : f32
    %576 = vector.broadcast %cst_267 : f32 to vector<1x128xf32>
    %577 = arith.cmpf oge, %575, %576 : vector<1x128xf32>
    %578 = arith.extui %577 : vector<1x128xi1> to vector<1x128xi32>
    %579 = arith.sitofp %578 : vector<1x128xi32> to vector<1x128xf32>
    %cst_268 = arith.constant 1.000000e+00 : f32
    %580 = vector.broadcast %cst_268 : f32 to vector<1x128xf32>
    %581 = arith.mulf %579, %580 : vector<1x128xf32>
    %c7_269 = arith.constant 7 : index
    %c0_270 = arith.constant 0 : index
    %582 = vector.load %arg4[%c7_269, %c0_270] : memref<16x128xf32, #tpu.memory_space<vmem>>, vector<1x128xf32>
    tpu.vector_store %arg4[%c7_269, %c0_270], %581 {strides = array<i32>} : memref<16x128xf32, #tpu.memory_space<vmem>>, vector<1x128xf32>,
    %c8_271 = arith.constant 8 : index
    %c0_272 = arith.constant 0 : index
    %583 = vector.load %arg7[%c8_271, %c0_272] : memref<16x128xf32, #tpu.memory_space<vmem>>, vector<1x128xf32>
    %cst_273 = arith.constant -4.000000e+00 : f32
    %584 = vector.broadcast %cst_273 : f32 to vector<1x128xf32>
    %585 = arith.mulf %584, %579 : vector<1x128xf32>
    %586 = arith.addf %583, %585 : vector<1x128xf32>
    %cst_274 = arith.constant -2.9430356 : f32
    %587 = vector.broadcast %cst_274 : f32 to vector<1x128xf32>
    %588 = arith.mulf %587, %550 : vector<1x128xf32>
    %589 = arith.addf %586, %588 : vector<1x128xf32>
    %cst_275 = arith.constant -1.62402344 : f32
    %590 = vector.broadcast %cst_275 : f32 to vector<1x128xf32>
    %591 = arith.mulf %590, %524 : vector<1x128xf32>
    %592 = arith.addf %589, %591 : vector<1x128xf32>
    %cst_276 = arith.constant -0.79659307 : f32
    %593 = vector.broadcast %cst_276 : f32 to vector<1x128xf32>
    %594 = arith.mulf %593, %501 : vector<1x128xf32>
    %595 = arith.addf %592, %594 : vector<1x128xf32>
    %cst_277 = arith.constant -0.366312772 : f32
    %596 = vector.broadcast %cst_277 : f32 to vector<1x128xf32>
    %597 = arith.mulf %596, %481 : vector<1x128xf32>
    %598 = arith.addf %595, %597 : vector<1x128xf32>
    %cst_278 = arith.constant -0.161710724 : f32
    %599 = vector.broadcast %cst_278 : f32 to vector<1x128xf32>
    %600 = arith.mulf %599, %464 : vector<1x128xf32>
    %601 = arith.addf %598, %600 : vector<1x128xf32>
    %cst_279 = arith.constant -0.069405064 : f32
    %602 = vector.broadcast %cst_279 : f32 to vector<1x128xf32>
    %603 = arith.mulf %602, %450 : vector<1x128xf32>
    %604 = arith.addf %601, %603 : vector<1x128xf32>
    %cst_280 = arith.constant -0.0291802231 : f32
    %605 = vector.broadcast %cst_280 : f32 to vector<1x128xf32>
    %606 = arith.mulf %605, %439 : vector<1x128xf32>
    %607 = arith.addf %604, %606 : vector<1x128xf32>
    %cst_281 = arith.constant 1.000000e+00 : f32
    %608 = vector.broadcast %cst_281 : f32 to vector<1x128xf32>
    %609 = arith.cmpf oge, %607, %608 : vector<1x128xf32>
    %610 = arith.extui %609 : vector<1x128xi1> to vector<1x128xi32>
    %611 = arith.sitofp %610 : vector<1x128xi32> to vector<1x128xf32>
    %cst_282 = arith.constant 1.000000e+00 : f32
    %612 = vector.broadcast %cst_282 : f32 to vector<1x128xf32>
    %613 = arith.mulf %611, %612 : vector<1x128xf32>
    %c8_283 = arith.constant 8 : index
    %c0_284 = arith.constant 0 : index
    %614 = vector.load %arg4[%c8_283, %c0_284] : memref<16x128xf32, #tpu.memory_space<vmem>>, vector<1x128xf32>
    tpu.vector_store %arg4[%c8_283, %c0_284], %613 {strides = array<i32>} : memref<16x128xf32, #tpu.memory_space<vmem>>, vector<1x128xf32>,
    %c9_285 = arith.constant 9 : index
    %c0_286 = arith.constant 0 : index
    %615 = vector.load %arg7[%c9_285, %c0_286] : memref<16x128xf32, #tpu.memory_space<vmem>>, vector<1x128xf32>
    %cst_287 = arith.constant -4.000000e+00 : f32
    %616 = vector.broadcast %cst_287 : f32 to vector<1x128xf32>
    %617 = arith.mulf %616, %611 : vector<1x128xf32>
    %618 = arith.addf %615, %617 : vector<1x128xf32>
    %cst_288 = arith.constant -2.9430356 : f32
    %619 = vector.broadcast %cst_288 : f32 to vector<1x128xf32>
    %620 = arith.mulf %619, %579 : vector<1x128xf32>
    %621 = arith.addf %618, %620 : vector<1x128xf32>
    %cst_289 = arith.constant -1.62402344 : f32
    %622 = vector.broadcast %cst_289 : f32 to vector<1x128xf32>
    %623 = arith.mulf %622, %550 : vector<1x128xf32>
    %624 = arith.addf %621, %623 : vector<1x128xf32>
    %cst_290 = arith.constant -0.79659307 : f32
    %625 = vector.broadcast %cst_290 : f32 to vector<1x128xf32>
    %626 = arith.mulf %625, %524 : vector<1x128xf32>
    %627 = arith.addf %624, %626 : vector<1x128xf32>
    %cst_291 = arith.constant -0.366312772 : f32
    %628 = vector.broadcast %cst_291 : f32 to vector<1x128xf32>
    %629 = arith.mulf %628, %501 : vector<1x128xf32>
    %630 = arith.addf %627, %629 : vector<1x128xf32>
    %cst_292 = arith.constant -0.161710724 : f32
    %631 = vector.broadcast %cst_292 : f32 to vector<1x128xf32>
    %632 = arith.mulf %631, %481 : vector<1x128xf32>
    %633 = arith.addf %630, %632 : vector<1x128xf32>
    %cst_293 = arith.constant -0.069405064 : f32
    %634 = vector.broadcast %cst_293 : f32 to vector<1x128xf32>
    %635 = arith.mulf %634, %464 : vector<1x128xf32>
    %636 = arith.addf %633, %635 : vector<1x128xf32>
    %cst_294 = arith.constant -0.0291802231 : f32
    %637 = vector.broadcast %cst_294 : f32 to vector<1x128xf32>
    %638 = arith.mulf %637, %450 : vector<1x128xf32>
    %639 = arith.addf %636, %638 : vector<1x128xf32>
    %cst_295 = arith.constant -0.0120766545 : f32
    %640 = vector.broadcast %cst_295 : f32 to vector<1x128xf32>
    %641 = arith.mulf %640, %439 : vector<1x128xf32>
    %642 = arith.addf %639, %641 : vector<1x128xf32>
    %cst_296 = arith.constant 1.000000e+00 : f32
    %643 = vector.broadcast %cst_296 : f32 to vector<1x128xf32>
    %644 = arith.cmpf oge, %642, %643 : vector<1x128xf32>
    %645 = arith.extui %644 : vector<1x128xi1> to vector<1x128xi32>
    %646 = arith.sitofp %645 : vector<1x128xi32> to vector<1x128xf32>
    %cst_297 = arith.constant 1.000000e+00 : f32
    %647 = vector.broadcast %cst_297 : f32 to vector<1x128xf32>
    %648 = arith.mulf %646, %647 : vector<1x128xf32>
    %c9_298 = arith.constant 9 : index
    %c0_299 = arith.constant 0 : index
    %649 = vector.load %arg4[%c9_298, %c0_299] : memref<16x128xf32, #tpu.memory_space<vmem>>, vector<1x128xf32>
    tpu.vector_store %arg4[%c9_298, %c0_299], %648 {strides = array<i32>} : memref<16x128xf32, #tpu.memory_space<vmem>>, vector<1x128xf32>,
    %c10_300 = arith.constant 10 : index
    %c0_301 = arith.constant 0 : index
    %650 = vector.load %arg7[%c10_300, %c0_301] : memref<16x128xf32, #tpu.memory_space<vmem>>, vector<1x128xf32>
    %cst_302 = arith.constant -4.000000e+00 : f32
    %651 = vector.broadcast %cst_302 : f32 to vector<1x128xf32>
    %652 = arith.mulf %651, %646 : vector<1x128xf32>
    %653 = arith.addf %650, %652 : vector<1x128xf32>
    %cst_303 = arith.constant -2.9430356 : f32
    %654 = vector.broadcast %cst_303 : f32 to vector<1x128xf32>
    %655 = arith.mulf %654, %611 : vector<1x128xf32>
    %656 = arith.addf %653, %655 : vector<1x128xf32>
    %cst_304 = arith.constant -1.62402344 : f32
    %657 = vector.broadcast %cst_304 : f32 to vector<1x128xf32>
    %658 = arith.mulf %657, %579 : vector<1x128xf32>
    %659 = arith.addf %656, %658 : vector<1x128xf32>
    %cst_305 = arith.constant -0.79659307 : f32
    %660 = vector.broadcast %cst_305 : f32 to vector<1x128xf32>
    %661 = arith.mulf %660, %550 : vector<1x128xf32>
    %662 = arith.addf %659, %661 : vector<1x128xf32>
    %cst_306 = arith.constant -0.366312772 : f32
    %663 = vector.broadcast %cst_306 : f32 to vector<1x128xf32>
    %664 = arith.mulf %663, %524 : vector<1x128xf32>
    %665 = arith.addf %662, %664 : vector<1x128xf32>
    %cst_307 = arith.constant -0.161710724 : f32
    %666 = vector.broadcast %cst_307 : f32 to vector<1x128xf32>
    %667 = arith.mulf %666, %501 : vector<1x128xf32>
    %668 = arith.addf %665, %667 : vector<1x128xf32>
    %cst_308 = arith.constant -0.069405064 : f32
    %669 = vector.broadcast %cst_308 : f32 to vector<1x128xf32>
    %670 = arith.mulf %669, %481 : vector<1x128xf32>
    %671 = arith.addf %668, %670 : vector<1x128xf32>
    %cst_309 = arith.constant -0.0291802231 : f32
    %672 = vector.broadcast %cst_309 : f32 to vector<1x128xf32>
    %673 = arith.mulf %672, %464 : vector<1x128xf32>
    %674 = arith.addf %671, %673 : vector<1x128xf32>
    %cst_310 = arith.constant -0.0120766545 : f32
    %675 = vector.broadcast %cst_310 : f32 to vector<1x128xf32>
    %676 = arith.mulf %675, %450 : vector<1x128xf32>
    %677 = arith.addf %674, %676 : vector<1x128xf32>
    %cst_311 = arith.constant 1.000000e+00 : f32
    %678 = vector.broadcast %cst_311 : f32 to vector<1x128xf32>
    %679 = arith.cmpf oge, %677, %678 : vector<1x128xf32>
    %680 = arith.extui %679 : vector<1x128xi1> to vector<1x128xi32>
    %681 = arith.sitofp %680 : vector<1x128xi32> to vector<1x128xf32>
    %cst_312 = arith.constant 1.000000e+00 : f32
    %682 = vector.broadcast %cst_312 : f32 to vector<1x128xf32>
    %683 = arith.mulf %681, %682 : vector<1x128xf32>
    %c10_313 = arith.constant 10 : index
    %c0_314 = arith.constant 0 : index
    %684 = vector.load %arg4[%c10_313, %c0_314] : memref<16x128xf32, #tpu.memory_space<vmem>>, vector<1x128xf32>
    tpu.vector_store %arg4[%c10_313, %c0_314], %683 {strides = array<i32>} : memref<16x128xf32, #tpu.memory_space<vmem>>, vector<1x128xf32>,
    %c11_315 = arith.constant 11 : index
    %c0_316 = arith.constant 0 : index
    %685 = vector.load %arg7[%c11_315, %c0_316] : memref<16x128xf32, #tpu.memory_space<vmem>>, vector<1x128xf32>
    %cst_317 = arith.constant -4.000000e+00 : f32
    %686 = vector.broadcast %cst_317 : f32 to vector<1x128xf32>
    %687 = arith.mulf %686, %681 : vector<1x128xf32>
    %688 = arith.addf %685, %687 : vector<1x128xf32>
    %cst_318 = arith.constant -2.9430356 : f32
    %689 = vector.broadcast %cst_318 : f32 to vector<1x128xf32>
    %690 = arith.mulf %689, %646 : vector<1x128xf32>
    %691 = arith.addf %688, %690 : vector<1x128xf32>
    %cst_319 = arith.constant -1.62402344 : f32
    %692 = vector.broadcast %cst_319 : f32 to vector<1x128xf32>
    %693 = arith.mulf %692, %611 : vector<1x128xf32>
    %694 = arith.addf %691, %693 : vector<1x128xf32>
    %cst_320 = arith.constant -0.79659307 : f32
    %695 = vector.broadcast %cst_320 : f32 to vector<1x128xf32>
    %696 = arith.mulf %695, %579 : vector<1x128xf32>
    %697 = arith.addf %694, %696 : vector<1x128xf32>
    %cst_321 = arith.constant -0.366312772 : f32
    %698 = vector.broadcast %cst_321 : f32 to vector<1x128xf32>
    %699 = arith.mulf %698, %550 : vector<1x128xf32>
    %700 = arith.addf %697, %699 : vector<1x128xf32>
    %cst_322 = arith.constant -0.161710724 : f32
    %701 = vector.broadcast %cst_322 : f32 to vector<1x128xf32>
    %702 = arith.mulf %701, %524 : vector<1x128xf32>
    %703 = arith.addf %700, %702 : vector<1x128xf32>
    %cst_323 = arith.constant -0.069405064 : f32
    %704 = vector.broadcast %cst_323 : f32 to vector<1x128xf32>
    %705 = arith.mulf %704, %501 : vector<1x128xf32>
    %706 = arith.addf %703, %705 : vector<1x128xf32>
    %cst_324 = arith.constant -0.0291802231 : f32
    %707 = vector.broadcast %cst_324 : f32 to vector<1x128xf32>
    %708 = arith.mulf %707, %481 : vector<1x128xf32>
    %709 = arith.addf %706, %708 : vector<1x128xf32>
    %cst_325 = arith.constant -0.0120766545 : f32
    %710 = vector.broadcast %cst_325 : f32 to vector<1x128xf32>
    %711 = arith.mulf %710, %464 : vector<1x128xf32>
    %712 = arith.addf %709, %711 : vector<1x128xf32>
    %cst_326 = arith.constant 1.000000e+00 : f32
    %713 = vector.broadcast %cst_326 : f32 to vector<1x128xf32>
    %714 = arith.cmpf oge, %712, %713 : vector<1x128xf32>
    %715 = arith.extui %714 : vector<1x128xi1> to vector<1x128xi32>
    %716 = arith.sitofp %715 : vector<1x128xi32> to vector<1x128xf32>
    %cst_327 = arith.constant 1.000000e+00 : f32
    %717 = vector.broadcast %cst_327 : f32 to vector<1x128xf32>
    %718 = arith.mulf %716, %717 : vector<1x128xf32>
    %c11_328 = arith.constant 11 : index
    %c0_329 = arith.constant 0 : index
    %719 = vector.load %arg4[%c11_328, %c0_329] : memref<16x128xf32, #tpu.memory_space<vmem>>, vector<1x128xf32>
    tpu.vector_store %arg4[%c11_328, %c0_329], %718 {strides = array<i32>} : memref<16x128xf32, #tpu.memory_space<vmem>>, vector<1x128xf32>,
    %c12_330 = arith.constant 12 : index
    %c0_331 = arith.constant 0 : index
    %720 = vector.load %arg7[%c12_330, %c0_331] : memref<16x128xf32, #tpu.memory_space<vmem>>, vector<1x128xf32>
    %cst_332 = arith.constant -4.000000e+00 : f32
    %721 = vector.broadcast %cst_332 : f32 to vector<1x128xf32>
    %722 = arith.mulf %721, %716 : vector<1x128xf32>
    %723 = arith.addf %720, %722 : vector<1x128xf32>
    %cst_333 = arith.constant -2.9430356 : f32
    %724 = vector.broadcast %cst_333 : f32 to vector<1x128xf32>
    %725 = arith.mulf %724, %681 : vector<1x128xf32>
    %726 = arith.addf %723, %725 : vector<1x128xf32>
    %cst_334 = arith.constant -1.62402344 : f32
    %727 = vector.broadcast %cst_334 : f32 to vector<1x128xf32>
    %728 = arith.mulf %727, %646 : vector<1x128xf32>
    %729 = arith.addf %726, %728 : vector<1x128xf32>
    %cst_335 = arith.constant -0.79659307 : f32
    %730 = vector.broadcast %cst_335 : f32 to vector<1x128xf32>
    %731 = arith.mulf %730, %611 : vector<1x128xf32>
    %732 = arith.addf %729, %731 : vector<1x128xf32>
    %cst_336 = arith.constant -0.366312772 : f32
    %733 = vector.broadcast %cst_336 : f32 to vector<1x128xf32>
    %734 = arith.mulf %733, %579 : vector<1x128xf32>
    %735 = arith.addf %732, %734 : vector<1x128xf32>
    %cst_337 = arith.constant -0.161710724 : f32
    %736 = vector.broadcast %cst_337 : f32 to vector<1x128xf32>
    %737 = arith.mulf %736, %550 : vector<1x128xf32>
    %738 = arith.addf %735, %737 : vector<1x128xf32>
    %cst_338 = arith.constant -0.069405064 : f32
    %739 = vector.broadcast %cst_338 : f32 to vector<1x128xf32>
    %740 = arith.mulf %739, %524 : vector<1x128xf32>
    %741 = arith.addf %738, %740 : vector<1x128xf32>
    %cst_339 = arith.constant -0.0291802231 : f32
    %742 = vector.broadcast %cst_339 : f32 to vector<1x128xf32>
    %743 = arith.mulf %742, %501 : vector<1x128xf32>
    %744 = arith.addf %741, %743 : vector<1x128xf32>
    %cst_340 = arith.constant -0.0120766545 : f32
    %745 = vector.broadcast %cst_340 : f32 to vector<1x128xf32>
    %746 = arith.mulf %745, %481 : vector<1x128xf32>
    %747 = arith.addf %744, %746 : vector<1x128xf32>
    %cst_341 = arith.constant 1.000000e+00 : f32
    %748 = vector.broadcast %cst_341 : f32 to vector<1x128xf32>
    %749 = arith.cmpf oge, %747, %748 : vector<1x128xf32>
    %750 = arith.extui %749 : vector<1x128xi1> to vector<1x128xi32>
    %751 = arith.sitofp %750 : vector<1x128xi32> to vector<1x128xf32>
    %cst_342 = arith.constant 1.000000e+00 : f32
    %752 = vector.broadcast %cst_342 : f32 to vector<1x128xf32>
    %753 = arith.mulf %751, %752 : vector<1x128xf32>
    %c12_343 = arith.constant 12 : index
    %c0_344 = arith.constant 0 : index
    %754 = vector.load %arg4[%c12_343, %c0_344] : memref<16x128xf32, #tpu.memory_space<vmem>>, vector<1x128xf32>
    tpu.vector_store %arg4[%c12_343, %c0_344], %753 {strides = array<i32>} : memref<16x128xf32, #tpu.memory_space<vmem>>, vector<1x128xf32>,
    %c13_345 = arith.constant 13 : index
    %c0_346 = arith.constant 0 : index
    %755 = vector.load %arg7[%c13_345, %c0_346] : memref<16x128xf32, #tpu.memory_space<vmem>>, vector<1x128xf32>
    %cst_347 = arith.constant -4.000000e+00 : f32
    %756 = vector.broadcast %cst_347 : f32 to vector<1x128xf32>
    %757 = arith.mulf %756, %751 : vector<1x128xf32>
    %758 = arith.addf %755, %757 : vector<1x128xf32>
    %cst_348 = arith.constant -2.9430356 : f32
    %759 = vector.broadcast %cst_348 : f32 to vector<1x128xf32>
    %760 = arith.mulf %759, %716 : vector<1x128xf32>
    %761 = arith.addf %758, %760 : vector<1x128xf32>
    %cst_349 = arith.constant -1.62402344 : f32
    %762 = vector.broadcast %cst_349 : f32 to vector<1x128xf32>
    %763 = arith.mulf %762, %681 : vector<1x128xf32>
    %764 = arith.addf %761, %763 : vector<1x128xf32>
    %cst_350 = arith.constant -0.79659307 : f32
    %765 = vector.broadcast %cst_350 : f32 to vector<1x128xf32>
    %766 = arith.mulf %765, %646 : vector<1x128xf32>
    %767 = arith.addf %764, %766 : vector<1x128xf32>
    %cst_351 = arith.constant -0.366312772 : f32
    %768 = vector.broadcast %cst_351 : f32 to vector<1x128xf32>
    %769 = arith.mulf %768, %611 : vector<1x128xf32>
    %770 = arith.addf %767, %769 : vector<1x128xf32>
    %cst_352 = arith.constant -0.161710724 : f32
    %771 = vector.broadcast %cst_352 : f32 to vector<1x128xf32>
    %772 = arith.mulf %771, %579 : vector<1x128xf32>
    %773 = arith.addf %770, %772 : vector<1x128xf32>
    %cst_353 = arith.constant -0.069405064 : f32
    %774 = vector.broadcast %cst_353 : f32 to vector<1x128xf32>
    %775 = arith.mulf %774, %550 : vector<1x128xf32>
    %776 = arith.addf %773, %775 : vector<1x128xf32>
    %cst_354 = arith.constant -0.0291802231 : f32
    %777 = vector.broadcast %cst_354 : f32 to vector<1x128xf32>
    %778 = arith.mulf %777, %524 : vector<1x128xf32>
    %779 = arith.addf %776, %778 : vector<1x128xf32>
    %cst_355 = arith.constant -0.0120766545 : f32
    %780 = vector.broadcast %cst_355 : f32 to vector<1x128xf32>
    %781 = arith.mulf %780, %501 : vector<1x128xf32>
    %782 = arith.addf %779, %781 : vector<1x128xf32>
    %cst_356 = arith.constant 1.000000e+00 : f32
    %783 = vector.broadcast %cst_356 : f32 to vector<1x128xf32>
    %784 = arith.cmpf oge, %782, %783 : vector<1x128xf32>
    %785 = arith.extui %784 : vector<1x128xi1> to vector<1x128xi32>
    %786 = arith.sitofp %785 : vector<1x128xi32> to vector<1x128xf32>
    %cst_357 = arith.constant 1.000000e+00 : f32
    %787 = vector.broadcast %cst_357 : f32 to vector<1x128xf32>
    %788 = arith.mulf %786, %787 : vector<1x128xf32>
    %c13_358 = arith.constant 13 : index
    %c0_359 = arith.constant 0 : index
    %789 = vector.load %arg4[%c13_358, %c0_359] : memref<16x128xf32, #tpu.memory_space<vmem>>, vector<1x128xf32>
    tpu.vector_store %arg4[%c13_358, %c0_359], %788 {strides = array<i32>} : memref<16x128xf32, #tpu.memory_space<vmem>>, vector<1x128xf32>,
    %c14_360 = arith.constant 14 : index
    %c0_361 = arith.constant 0 : index
    %790 = vector.load %arg7[%c14_360, %c0_361] : memref<16x128xf32, #tpu.memory_space<vmem>>, vector<1x128xf32>
    %cst_362 = arith.constant -4.000000e+00 : f32
    %791 = vector.broadcast %cst_362 : f32 to vector<1x128xf32>
    %792 = arith.mulf %791, %786 : vector<1x128xf32>
    %793 = arith.addf %790, %792 : vector<1x128xf32>
    %cst_363 = arith.constant -2.9430356 : f32
    %794 = vector.broadcast %cst_363 : f32 to vector<1x128xf32>
    %795 = arith.mulf %794, %751 : vector<1x128xf32>
    %796 = arith.addf %793, %795 : vector<1x128xf32>
    %cst_364 = arith.constant -1.62402344 : f32
    %797 = vector.broadcast %cst_364 : f32 to vector<1x128xf32>
    %798 = arith.mulf %797, %716 : vector<1x128xf32>
    %799 = arith.addf %796, %798 : vector<1x128xf32>
    %cst_365 = arith.constant -0.79659307 : f32
    %800 = vector.broadcast %cst_365 : f32 to vector<1x128xf32>
    %801 = arith.mulf %800, %681 : vector<1x128xf32>
    %802 = arith.addf %799, %801 : vector<1x128xf32>
    %cst_366 = arith.constant -0.366312772 : f32
    %803 = vector.broadcast %cst_366 : f32 to vector<1x128xf32>
    %804 = arith.mulf %803, %646 : vector<1x128xf32>
    %805 = arith.addf %802, %804 : vector<1x128xf32>
    %cst_367 = arith.constant -0.161710724 : f32
    %806 = vector.broadcast %cst_367 : f32 to vector<1x128xf32>
    %807 = arith.mulf %806, %611 : vector<1x128xf32>
    %808 = arith.addf %805, %807 : vector<1x128xf32>
    %cst_368 = arith.constant -0.069405064 : f32
    %809 = vector.broadcast %cst_368 : f32 to vector<1x128xf32>
    %810 = arith.mulf %809, %579 : vector<1x128xf32>
    %811 = arith.addf %808, %810 : vector<1x128xf32>
    %cst_369 = arith.constant -0.0291802231 : f32
    %812 = vector.broadcast %cst_369 : f32 to vector<1x128xf32>
    %813 = arith.mulf %812, %550 : vector<1x128xf32>
    %814 = arith.addf %811, %813 : vector<1x128xf32>
    %cst_370 = arith.constant -0.0120766545 : f32
    %815 = vector.broadcast %cst_370 : f32 to vector<1x128xf32>
    %816 = arith.mulf %815, %524 : vector<1x128xf32>
    %817 = arith.addf %814, %816 : vector<1x128xf32>
    %cst_371 = arith.constant 1.000000e+00 : f32
    %818 = vector.broadcast %cst_371 : f32 to vector<1x128xf32>
    %819 = arith.cmpf oge, %817, %818 : vector<1x128xf32>
    %820 = arith.extui %819 : vector<1x128xi1> to vector<1x128xi32>
    %821 = arith.sitofp %820 : vector<1x128xi32> to vector<1x128xf32>
    %cst_372 = arith.constant 1.000000e+00 : f32
    %822 = vector.broadcast %cst_372 : f32 to vector<1x128xf32>
    %823 = arith.mulf %821, %822 : vector<1x128xf32>
    %c14_373 = arith.constant 14 : index
    %c0_374 = arith.constant 0 : index
    %824 = vector.load %arg4[%c14_373, %c0_374] : memref<16x128xf32, #tpu.memory_space<vmem>>, vector<1x128xf32>
    tpu.vector_store %arg4[%c14_373, %c0_374], %823 {strides = array<i32>} : memref<16x128xf32, #tpu.memory_space<vmem>>, vector<1x128xf32>,
    %c15_375 = arith.constant 15 : index
    %c0_376 = arith.constant 0 : index
    %825 = vector.load %arg7[%c15_375, %c0_376] : memref<16x128xf32, #tpu.memory_space<vmem>>, vector<1x128xf32>
    %cst_377 = arith.constant -4.000000e+00 : f32
    %826 = vector.broadcast %cst_377 : f32 to vector<1x128xf32>
    %827 = arith.mulf %826, %821 : vector<1x128xf32>
    %828 = arith.addf %825, %827 : vector<1x128xf32>
    %cst_378 = arith.constant -2.9430356 : f32
    %829 = vector.broadcast %cst_378 : f32 to vector<1x128xf32>
    %830 = arith.mulf %829, %786 : vector<1x128xf32>
    %831 = arith.addf %828, %830 : vector<1x128xf32>
    %cst_379 = arith.constant -1.62402344 : f32
    %832 = vector.broadcast %cst_379 : f32 to vector<1x128xf32>
    %833 = arith.mulf %832, %751 : vector<1x128xf32>
    %834 = arith.addf %831, %833 : vector<1x128xf32>
    %cst_380 = arith.constant -0.79659307 : f32
    %835 = vector.broadcast %cst_380 : f32 to vector<1x128xf32>
    %836 = arith.mulf %835, %716 : vector<1x128xf32>
    %837 = arith.addf %834, %836 : vector<1x128xf32>
    %cst_381 = arith.constant -0.366312772 : f32
    %838 = vector.broadcast %cst_381 : f32 to vector<1x128xf32>
    %839 = arith.mulf %838, %681 : vector<1x128xf32>
    %840 = arith.addf %837, %839 : vector<1x128xf32>
    %cst_382 = arith.constant -0.161710724 : f32
    %841 = vector.broadcast %cst_382 : f32 to vector<1x128xf32>
    %842 = arith.mulf %841, %646 : vector<1x128xf32>
    %843 = arith.addf %840, %842 : vector<1x128xf32>
    %cst_383 = arith.constant -0.069405064 : f32
    %844 = vector.broadcast %cst_383 : f32 to vector<1x128xf32>
    %845 = arith.mulf %844, %611 : vector<1x128xf32>
    %846 = arith.addf %843, %845 : vector<1x128xf32>
    %cst_384 = arith.constant -0.0291802231 : f32
    %847 = vector.broadcast %cst_384 : f32 to vector<1x128xf32>
    %848 = arith.mulf %847, %579 : vector<1x128xf32>
    %849 = arith.addf %846, %848 : vector<1x128xf32>
    %cst_385 = arith.constant -0.0120766545 : f32
    %850 = vector.broadcast %cst_385 : f32 to vector<1x128xf32>
    %851 = arith.mulf %850, %550 : vector<1x128xf32>
    %852 = arith.addf %849, %851 : vector<1x128xf32>
    %cst_386 = arith.constant 1.000000e+00 : f32
    %853 = vector.broadcast %cst_386 : f32 to vector<1x128xf32>
    %854 = arith.cmpf oge, %852, %853 : vector<1x128xf32>
    %855 = arith.extui %854 : vector<1x128xi1> to vector<1x128xi32>
    %856 = arith.sitofp %855 : vector<1x128xi32> to vector<1x128xf32>
    %cst_387 = arith.constant 1.000000e+00 : f32
    %857 = vector.broadcast %cst_387 : f32 to vector<1x128xf32>
    %858 = arith.mulf %856, %857 : vector<1x128xf32>
    %c15_388 = arith.constant 15 : index
    %c0_389 = arith.constant 0 : index
    %859 = vector.load %arg4[%c15_388, %c0_389] : memref<16x128xf32, #tpu.memory_space<vmem>>, vector<1x128xf32>
    tpu.vector_store %arg4[%c15_388, %c0_389], %858 {strides = array<i32>} : memref<16x128xf32, #tpu.memory_space<vmem>>, vector<1x128xf32>,
    return
  }
}

</mosaic_0001>

<bundles_post_ra>
// kernel: network_forward.1
= control target key start
LH: loop header
LB: loop body
LE: loop exit
PB: predicated region body
PF: predicated region fallthrough
CT: control target
= control target key end

     0   :  { %vm20_vm0 = vcmask 64512   ;;  %v988_v30 = vmov 0.0   ;;  %s1415_s1 = inlined_call_operand.vmem [shape: f32[8,128], index: 1, kind: input, shape index: {}]   ;;  %s1416_s0 = inlined_call_operand.vmem [shape: f32[16,8], index: 0, kind: input, shape index: {}]   ;;  %s1417_s2 = inlined_call_operand.vmem [shape: f32[128,128], index: 2, kind: input, shape index: {}]   ;;  %s1418_s3 = inlined_call_operand.vmem [shape: f32[16,16], index: 3, kind: input, shape index: {}]   ;;  %s1419_s4 = inlined_call_operand.vmem [shape: f32[16,128], index: 4, kind: output, shape index: {}]  }
   0x1   :  { %v19_v0 = vld [vmem:[%s1415_s1] sm:$0xff]  ;;  %v18_v2 = vld [vmem:[%s1416_s0 + $0x8] sm:$0xff]  ;;  %v386_v5 = vld [vmem:[%s1417_s2 + $0x10] sm:$0xff] }
   0x2   :  { %v17_v1 = vld [vmem:[%s1416_s0] sm:$0xff]  ;;  %904 = vmatprep.subr.mxu0 %v19_v0  ;;  %v385_v4 = vld [vmem:[%s1417_s2 + $0x8] sm:$0xff]  ;;  %v387_v7 = vld [vmem:[%s1417_s2 + $0x18] sm:$0xff] }
   0x3   :  { %906 = vmatprep.mubr.msk.f32.mxu0 %vm20_vm0, %v17_v1  ;;  %905 = vmatpush3.msra.mxu0 %v19_v0  ;;  %v384_v3 = vld [vmem:[%s1417_s2] sm:$0xff]  ;;  %v955_v8 = vpack.c.bf16 %v387_v7, %v386_v5  ;;  %v389_v10 = vld [vmem:[%s1417_s2 + $0x28] sm:$0xff]  ;;  %v390_v12 = vld [vmem:[%s1417_s2 + $0x30] sm:$0xff] }
   0x4   :  { %907 = vmatmul.mubr.msk.f32.vlgmr.msra.gmra.mrb[0].mxu0 %vm20_vm0, %v18_v2  ;;  %v951_v6 = vpack.c.bf16 %v385_v4, %v384_v3  ;;  %v388_v9 = vld [vmem:[%s1417_s2 + $0x20] sm:$0xff]  ;;  %v391_v13 = vld [vmem:[%s1417_s2 + $0x38] sm:$0xff]  ;;  %v393_v16 = vld [vmem:[%s1417_s2 + $0x48] sm:$0xff] }
   0x5   :  { %v959_v11 = vpack.c.bf16 %v389_v10, %v388_v9  ;;  %v963_v14 = vpack.c.bf16 %v391_v13, %v390_v12  ;;  %v392_v15 = vld [vmem:[%s1417_s2 + $0x40] sm:$0xff]  ;;  %v394_v18 = vld [vmem:[%s1417_s2 + $0x50] sm:$0xff]  ;;  %v395_v19 = vld [vmem:[%s1417_s2 + $0x58] sm:$0xff] }
   0x6   :  { %952 = vmatprep.subr.bf16.mxu1 %v951_v6  ;;  %v967_v17 = vpack.c.bf16 %v393_v16, %v392_v15  ;;  %v971_v20 = vpack.c.bf16 %v395_v19, %v394_v18  ;;  %v396_v21 = vld [vmem:[%s1417_s2 + $0x60] sm:$0xff]  ;;  %v397_v22 = vld [vmem:[%s1417_s2 + $0x68] sm:$0xff]  ;;  %v398_v25 = vld [vmem:[%s1417_s2 + $0x70] sm:$0xff] }
   0x7   :  { %954 = vmatpush3.bf16.msra.mxu1 %v951_v6  ;;  %v975_v23 = vpack.c.bf16 %v397_v22, %v396_v21  ;;  %v399_v26 = vld [vmem:[%s1417_s2 + $0x78] sm:$0xff] }
   0x8   :  { %956 = vmatprep.subr.bf16.mxu1 %v955_v8  ;;  %v979_v28 = vpack.c.bf16 %v399_v26, %v398_v25 }
   0xb   :  { %958 = vmatpush3.bf16.msra.mxu1 %v955_v8 }
   0xc   :  { %960 = vmatprep.subr.bf16.mxu1 %v959_v11 }
   0xf   :  { %962 = vmatpush3.bf16.msra.mxu1 %v959_v11 }
  0x10   :  { %964 = vmatprep.subr.bf16.mxu1 %v963_v14 }
  0x13   :  { %966 = vmatpush3.bf16.msra.mxu1 %v963_v14 }
  0x14   :  { %968 = vmatprep.subr.bf16.mxu1 %v967_v17 }
  0x17   :  { %970 = vmatpush3.bf16.msra.mxu1 %v967_v17 }
  0x18   :  { %972 = vmatprep.subr.bf16.mxu1 %v971_v20 }
  0x1b   :  { %974 = vmatpush3.bf16.msra.mxu1 %v971_v20 }
  0x1c   :  { %976 = vmatprep.subr.bf16.mxu1 %v975_v23 }
  0x1f   :  { %978 = vmatpush3.bf16.msra.mxu1 %v975_v23 }
  0x20   :  { %980 = vmatprep.subr.bf16.mxu1 %v979_v28 }
  0x23   :  { %982 = vmatpush3.bf16.msra.mxu1 %v979_v28 }
  0xd7   :  { %v908_v24 = vpop.f32.mrb[0].mxu0 }
  0xd8   :  { %103 = vst [vmem:[#allocation2 + $0x8] sm:$0xff] %v908_v24  ;;  %v93_v27 = vpop.f32.mrb[1].mxu0 }
  0xd9   :  { %102 = vst [vmem:[#allocation2] sm:$0xff] %v93_v27 }
  0xe0   :  { %v104_v29 = vld [vmem:[#allocation2] sm:$0x1]  ;;  %v109_v33 = vld [vmem:[#allocation2 + $0x1] sm:$0x1]  ;;  %v116_v37 = vld [vmem:[#allocation2 + $0x2] sm:$0x1] }
  0xe1   :  { %vm105_vm1 = vcmp.ge.f32.partialorder %v104_v29, 1.0  ;;  %v125_v43 = vld [vmem:[#allocation2 + $0x3] sm:$0x1]  ;;  %v136_v51 = vld [vmem:[#allocation2 + $0x4] sm:$0x1] }
  0xe2   :  { %v1072_v31 = vsel %vm105_vm1, 1.0, %v988_v30  ;;  %v149_v61 = vld [vmem:[#allocation2 + $0x5] sm:$0x1]  ;;  %v164_v9 = vld [vmem:[#allocation2 + $0x6] sm:$0x1]  ;;  %vm477_vm1 = vcmask 130048  }
  0xe3   :  { %v110_v32 = vmul.f32 -4.0, %v1072_v31  ;;  %108 = vst [vmem:[#allocation3] sm:$0x1] %v1072_v31  ;;  %v119_v39 = vmul.f32 -2.9430356, %v1072_v31  ;;  %v130_v47 = vmul.f32 -1.6240234, %v1072_v31 }
  0xe4   :  { %v143_v57 = vmul.f32 -0.79659307, %v1072_v31  ;;  %v158_v5 = vmul.f32 -0.36631277, %v1072_v31  ;;  %v175_v19 = vmul.f32 -0.16171072, %v1072_v31 }
  0xe5   :  { %v111_v34 = vadd.f32 %v110_v32, %v109_v33  ;;  %v181_v23 = vld [vmem:[#allocation2 + $0x7] sm:$0x1] }
  0xe7   :  { %vm112_vm2 = vcmp.ge.f32.partialorder %v111_v34, 1.0 }
  0xe8   :  { %v1077_v35 = vsel %vm112_vm2, 1.0, %v988_v30 }
  0xe9   :  { %v117_v36 = vmul.f32 -4.0, %v1077_v35  ;;  %115 = vst [vmem:[#allocation3 + $0x1] sm:$0x1] %v1077_v35  ;;  %v128_v45 = vmul.f32 -2.9430356, %v1077_v35  ;;  %v141_v55 = vmul.f32 -1.6240234, %v1077_v35 }
  0xea   :  { %v156_v3 = vmul.f32 -0.79659307, %v1077_v35  ;;  %v173_v17 = vmul.f32 -0.36631277, %v1077_v35 }
  0xeb   :  { %v118_v38 = vadd.f32 %v117_v36, %v116_v37  ;;  %v192_v36 = vmul.f32 -0.16171072, %v1077_v35 }
  0xed   :  { %v120_v40 = vadd.f32 %v119_v39, %v118_v38  ;;  %v194_v38 = vmul.f32 -0.069405064, %v1072_v31 }
  0xef   :  { %vm121_vm3 = vcmp.ge.f32.partialorder %v120_v40, 1.0 }
  0xf0   :  { %v1083_v41 = vsel %vm121_vm3, 1.0, %v988_v30 }
  0xf1   :  { %v126_v42 = vmul.f32 -4.0, %v1083_v41  ;;  %124 = vst [vmem:[#allocation3 + $0x2] sm:$0x1] %v1083_v41  ;;  %v139_v53 = vmul.f32 -2.9430356, %v1083_v41  ;;  %v154_v1 = vmul.f32 -1.6240234, %v1083_v41 }
  0xf2   :  { %v171_v15 = vmul.f32 -0.79659307, %v1083_v41  ;;  %v190_v33 = vmul.f32 -0.36631277, %v1083_v41 }
  0xf3   :  { %v127_v44 = vadd.f32 %v126_v42, %v125_v43  ;;  %v200_v43 = vld [vmem:[#allocation2 + $0x8] sm:$0x1] }
  0xf5   :  { %v129_v46 = vadd.f32 %v128_v45, %v127_v44 }
  0xf7   :  { %v131_v48 = vadd.f32 %v130_v47, %v129_v46 }
  0xf9   :  { %vm132_vm4 = vcmp.ge.f32.partialorder %v131_v48, 1.0 }
  0xfa   :  { %v1090_v49 = vsel %vm132_vm4, 1.0, %v988_v30 }
  0xfb   :  { %v137_v50 = vmul.f32 -4.0, %v1090_v49  ;;  %135 = vst [vmem:[#allocation3 + $0x3] sm:$0x1] %v1090_v49  ;;  %v152_v63 = vmul.f32 -2.9430356, %v1090_v49  ;;  %v169_v13 = vmul.f32 -1.6240234, %v1090_v49 }
  0xfc   :  { %v188_v29 = vmul.f32 -0.79659307, %v1090_v49 }
  0xfd   :  { %v138_v52 = vadd.f32 %v137_v50, %v136_v51 }
  0xff   :  { %v140_v54 = vadd.f32 %v139_v53, %v138_v52  ;;  %v209_v53 = vmul.f32 -0.36631277, %v1090_v49 }
 0x101   :  { %v142_v56 = vadd.f32 %v141_v55, %v140_v54  ;;  %v211_v55 = vmul.f32 -0.16171072, %v1083_v41 }
 0x103   :  { %v144_v58 = vadd.f32 %v143_v57, %v142_v56  ;;  %v213_v57 = vmul.f32 -0.069405064, %v1077_v35 }
 0x105   :  { %vm145_vm5 = vcmp.ge.f32.partialorder %v144_v58, 1.0 }
 0x106   :  { %v1098_v59 = vsel %vm145_vm5, 1.0, %v988_v30 }
 0x107   :  { %v150_v60 = vmul.f32 -4.0, %v1098_v59  ;;  %148 = vst [vmem:[#allocation3 + $0x4] sm:$0x1] %v1098_v59  ;;  %v167_v11 = vmul.f32 -2.9430356, %v1098_v59  ;;  %v186_v27 = vmul.f32 -1.6240234, %v1098_v59 }
 0x108   :  { %v207_v50 = vmul.f32 -0.79659307, %v1098_v59 }
 0x109   :  { %v151_v62 = vadd.f32 %v150_v60, %v149_v61  ;;  %v215_v60 = vmul.f32 -0.029180223, %v1072_v31 }
 0x10b   :  { %v153_v0 = vadd.f32 %v152_v63, %v151_v62 }
 0x10d   :  { %v155_v2 = vadd.f32 %v154_v1, %v153_v0  ;;  %v221_v0 = vld [vmem:[#allocation2 + $0x9] sm:$0x1] }
 0x10f   :  { %v157_v4 = vadd.f32 %v156_v3, %v155_v2 }
 0x111   :  { %v159_v6 = vadd.f32 %v158_v5, %v157_v4 }
 0x113   :  { %vm160_vm6 = vcmp.ge.f32.partialorder %v159_v6, 1.0 }
 0x114   :  { %v1107_v7 = vsel %vm160_vm6, 1.0, %v988_v30 }
 0x115   :  { %v165_v8 = vmul.f32 -4.0, %v1107_v7  ;;  %163 = vst [vmem:[#allocation3 + $0x5] sm:$0x1] %v1107_v7  ;;  %v184_v25 = vmul.f32 -2.9430356, %v1107_v7  ;;  %v205_v47 = vmul.f32 -1.6240234, %v1107_v7 }
 0x116   :  { %v228_v6 = vmul.f32 -0.79659307, %v1107_v7 }
 0x117   :  { %v166_v10 = vadd.f32 %v165_v8, %v164_v9  ;;  %v230_v9 = vmul.f32 -0.36631277, %v1098_v59 }
 0x119   :  { %v168_v12 = vadd.f32 %v167_v11, %v166_v10  ;;  %v232_v11 = vmul.f32 -0.16171072, %v1090_v49 }
 0x11b   :  { %v170_v14 = vadd.f32 %v169_v13, %v168_v12  ;;  %v234_v13 = vmul.f32 -0.069405064, %v1083_v41 }
 0x11d   :  { %v172_v16 = vadd.f32 %v171_v15, %v170_v14  ;;  %v236_v15 = vmul.f32 -0.029180223, %v1077_v35 }
 0x11f   :  { %v174_v18 = vadd.f32 %v173_v17, %v172_v16  ;;  %v238_v17 = vmul.f32 -0.0120766545, %v1072_v31 }
 0x121   :  { %v176_v20 = vadd.f32 %v175_v19, %v174_v18 }
 0x123   :  { %vm177_vm7 = vcmp.ge.f32.partialorder %v176_v20, 1.0 }
 0x124   :  { %v1117_v21 = vsel %vm177_vm7, 1.0, %v988_v30 }
 0x125   :  { %v182_v22 = vmul.f32 -4.0, %v1117_v21  ;;  %180 = vst [vmem:[#allocation3 + $0x6] sm:$0x1] %v1117_v21  ;;  %v203_v45 = vmul.f32 -2.9430356, %v1117_v21  ;;  %v226_v4 = vmul.f32 -1.6240234, %v1117_v21 }
 0x127   :  { %v183_v24 = vadd.f32 %v182_v22, %v181_v23  ;;  %v244_v22 = vld [vmem:[#allocation2 + $0xa] sm:$0x1] }
 0x129   :  { %v185_v26 = vadd.f32 %v184_v25, %v183_v24 }
 0x12b   :  { %v187_v28 = vadd.f32 %v186_v27, %v185_v26 }
 0x12d   :  { %v189_v32 = vadd.f32 %v188_v29, %v187_v28  ;;  %v251_v28 = vmul.f32 -0.79659307, %v1117_v21  ;;  %v253_v29 = vmul.f32 -0.36631277, %v1107_v7 }
 0x12f   :  { %v191_v34 = vadd.f32 %v190_v33, %v189_v32  ;;  %v255_v33 = vmul.f32 -0.16171072, %v1098_v59 }
 0x131   :  { %v193_v37 = vadd.f32 %v192_v36, %v191_v34  ;;  %v257_v36 = vmul.f32 -0.069405064, %v1090_v49 }
 0x133   :  { %v195_v39 = vadd.f32 %v194_v38, %v193_v37  ;;  %v259_v38 = vmul.f32 -0.029180223, %v1083_v41 }
 0x135   :  { %vm196_vm8 = vcmp.ge.f32.partialorder %v195_v39, 1.0 }
 0x136   :  { %v1128_v40 = vsel %vm196_vm8, 1.0, %v988_v30 }
 0x137   :  { %199 = vst [vmem:[#allocation3 + $0x7] sm:$0x1] %v1128_v40  ;;  %v201_v42 = vmul.f32 -4.0, %v1128_v40  ;;  %v224_v2 = vmul.f32 -2.9430356, %v1128_v40  ;;  %v249_v26 = vmul.f32 -1.6240234, %v1128_v40 }
 0x139   :  { %v202_v44 = vadd.f32 %v201_v42, %v200_v43  ;;  %v261_v42 = vmul.f32 -0.0120766545, %v1077_v35 }
 0x13b   :  { %v204_v46 = vadd.f32 %v203_v45, %v202_v44 }
 0x13d   :  { %v206_v48 = vadd.f32 %v205_v47, %v204_v46  ;;  %v267_v46 = vld [vmem:[#allocation2 + $0xb] sm:$0x1] }
 0x13e   :  { %v382_v51 = vld [vmem:[#allocation3] sm:$0xff] }
 0x13f   :  { %941 = vmatprep.mubr.f32.mxu1 %v382_v51  ;;  %v208_v52 = vadd.f32 %v207_v50, %v206_v48 }
 0x141   :  { %v210_v54 = vadd.f32 %v209_v53, %v208_v52  ;;  %v274_v53 = vmul.f32 -0.79659307, %v1128_v40 }
 0x143   :  { %v212_v56 = vadd.f32 %v211_v55, %v210_v54  ;;  %v276_v54 = vmul.f32 -0.36631277, %v1117_v21 }
 0x145   :  { %v214_v58 = vadd.f32 %v213_v57, %v212_v56  ;;  %v278_v56 = vmul.f32 -0.16171072, %v1107_v7 }
 0x147   :  { %v216_v61 = vadd.f32 %v215_v60, %v214_v58  ;;  %v280_v58 = vmul.f32 -0.069405064, %v1098_v59 }
 0x149   :  { %vm217_vm9 = vcmp.ge.f32.partialorder %v216_v61, 1.0  ;;  %v282_v61 = vmul.f32 -0.029180223, %v1090_v49 }
 0x14a   :  { %v1140_v62 = vsel %vm217_vm9, 1.0, %v988_v30 }
 0x14b   :  { %220 = vst [vmem:[#allocation3 + $0x8] sm:$0x1] %v1140_v62  ;;  %v222_v63 = vmul.f32 -4.0, %v1140_v62  ;;  %v247_v24 = vmul.f32 -2.9430356, %v1140_v62  ;;  %v272_v51 = vmul.f32 -1.6240234, %v1140_v62 }
 0x14d   :  { %v223_v1 = vadd.f32 %v222_v63, %v221_v0  ;;  %v284_v0 = vmul.f32 -0.0120766545, %v1083_v41 }
 0x14f   :  { %v225_v3 = vadd.f32 %v224_v2, %v223_v1 }
 0x151   :  { %v227_v5 = vadd.f32 %v226_v4, %v225_v3  ;;  %v290_v4 = vld [vmem:[#allocation2 + $0xc] sm:$0x1] }
 0x153   :  { %v229_v8 = vadd.f32 %v228_v6, %v227_v5 }
 0x155   :  { %v231_v10 = vadd.f32 %v230_v9, %v229_v8 }
 0x157   :  { %v233_v12 = vadd.f32 %v232_v11, %v231_v10  ;;  %v297_v11 = vmul.f32 -0.79659307, %v1140_v62 }
 0x159   :  { %v235_v14 = vadd.f32 %v234_v13, %v233_v12  ;;  %v299_v12 = vmul.f32 -0.36631277, %v1128_v40 }
 0x15b   :  { %v237_v16 = vadd.f32 %v236_v15, %v235_v14  ;;  %v301_v14 = vmul.f32 -0.16171072, %v1117_v21 }
 0x15d   :  { %v239_v18 = vadd.f32 %v238_v17, %v237_v16  ;;  %v303_v16 = vmul.f32 -0.069405064, %v1107_v7 }
 0x15f   :  { %vm240_vm10 = vcmp.ge.f32.partialorder %v239_v18, 1.0  ;;  %v305_v18 = vmul.f32 -0.029180223, %v1098_v59 }
 0x160   :  { %v1153_v19 = vsel %vm240_vm10, 1.0, %v988_v30 }
 0x161   :  { %243 = vst [vmem:[#allocation3 + $0x9] sm:$0x1] %v1153_v19  ;;  %v245_v20 = vmul.f32 -4.0, %v1153_v19  ;;  %v270_v48 = vmul.f32 -2.9430356, %v1153_v19  ;;  %v295_v9 = vmul.f32 -1.6240234, %v1153_v19 }
 0x163   :  { %v246_v23 = vadd.f32 %v245_v20, %v244_v22  ;;  %v307_v22 = vmul.f32 -0.0120766545, %v1090_v49 }
 0x165   :  { %v248_v25 = vadd.f32 %v247_v24, %v246_v23 }
 0x167   :  { %v250_v27 = vadd.f32 %v249_v26, %v248_v25  ;;  %v313_v26 = vld [vmem:[#allocation2 + $0xd] sm:$0x1] }
 0x169   :  { %v252_v31 = vadd.f32 %v251_v28, %v250_v27 }
 0x16b   :  { %v254_v32 = vadd.f32 %v253_v29, %v252_v31 }
 0x16d   :  { %v256_v34 = vadd.f32 %v255_v33, %v254_v32  ;;  %v320_v33 = vmul.f32 -0.79659307, %v1153_v19 }
 0x16f   :  { %v258_v37 = vadd.f32 %v257_v36, %v256_v34  ;;  %v322_v36 = vmul.f32 -0.36631277, %v1140_v62 }
 0x171   :  { %v260_v39 = vadd.f32 %v259_v38, %v258_v37  ;;  %v324_v37 = vmul.f32 -0.16171072, %v1128_v40 }
 0x173   :  { %v262_v43 = vadd.f32 %v261_v42, %v260_v39  ;;  %v326_v39 = vmul.f32 -0.069405064, %v1117_v21 }
 0x175   :  { %vm263_vm11 = vcmp.ge.f32.partialorder %v262_v43, 1.0  ;;  %v328_v43 = vmul.f32 -0.029180223, %v1107_v7 }
 0x176   :  { %v1166_v44 = vsel %vm263_vm11, 1.0, %v988_v30 }
 0x177   :  { %266 = vst [vmem:[#allocation3 + $0xa] sm:$0x1] %v1166_v44  ;;  %v268_v45 = vmul.f32 -4.0, %v1166_v44  ;;  %v293_v6 = vmul.f32 -2.9430356, %v1166_v44  ;;  %v318_v29 = vmul.f32 -1.6240234, %v1166_v44 }
 0x179   :  { %v269_v47 = vadd.f32 %v268_v45, %v267_v46  ;;  %v330_v46 = vmul.f32 -0.0120766545, %v1098_v59  ;;  %v347_v59 = vmul.f32 -0.16171072, %v1140_v62 }
 0x17b   :  { %v271_v50 = vadd.f32 %v270_v48, %v269_v47 }
 0x17d   :  { %v273_v52 = vadd.f32 %v272_v51, %v271_v50  ;;  %v336_v51 = vld [vmem:[#allocation2 + $0xe] sm:$0x1] }
 0x17f   :  { %v275_v35 = vadd.f32 %v274_v53, %v273_v52 }
 0x181   :  { %v277_v55 = vadd.f32 %v276_v54, %v275_v35 }
 0x183   :  { %v279_v57 = vadd.f32 %v278_v56, %v277_v55  ;;  %v343_v56 = vmul.f32 -0.79659307, %v1166_v44 }
 0x185   :  { %v281_v60 = vadd.f32 %v280_v58, %v279_v57  ;;  %v345_v58 = vmul.f32 -0.36631277, %v1153_v19 }
 0x187   :  { %v283_v63 = vadd.f32 %v282_v61, %v281_v60 }
 0x189   :  { %v285_v1 = vadd.f32 %v284_v0, %v283_v63  ;;  %v349_v63 = vmul.f32 -0.069405064, %v1128_v40 }
 0x18b   :  { %vm286_vm12 = vcmp.ge.f32.partialorder %v285_v1, 1.0  ;;  %v351_v1 = vmul.f32 -0.029180223, %v1117_v21 }
 0x18c   :  { %v1179_v2 = vsel %vm286_vm12, 1.0, %v988_v30 }
 0x18d   :  { %289 = vst [vmem:[#allocation3 + $0xb] sm:$0x1] %v1179_v2  ;;  %v291_v3 = vmul.f32 -4.0, %v1179_v2  ;;  %v316_v28 = vmul.f32 -2.9430356, %v1179_v2  ;;  %v341_v54 = vmul.f32 -1.6240234, %v1179_v2 }
 0x18f   :  { %v292_v5 = vadd.f32 %v291_v3, %v290_v4  ;;  %v353_v4 = vmul.f32 -0.0120766545, %v1107_v7  ;;  %v370_v7 = vmul.f32 -0.16171072, %v1153_v19  ;;  %v475_v19 = vld [vmem:[%s1418_s3] sm:$0xff] }
 0x190   :  { %948 = vmatprep.mubr.msk.f32.mxu0 %vm477_vm1, %v475_v19 }
 0x191   :  { %v294_v8 = vadd.f32 %v293_v6, %v292_v5 }
 0x193   :  { %v296_v10 = vadd.f32 %v295_v9, %v294_v8  ;;  %v359_v9 = vld [vmem:[#allocation2 + $0xf] sm:$0x1] }
 0x195   :  { %v298_v41 = vadd.f32 %v297_v11, %v296_v10 }
 0x197   :  { %v300_v13 = vadd.f32 %v299_v12, %v298_v41 }
 0x199   :  { %v302_v15 = vadd.f32 %v301_v14, %v300_v13  ;;  %v366_v14 = vmul.f32 -0.79659307, %v1179_v2 }
 0x19b   :  { %v304_v17 = vadd.f32 %v303_v16, %v302_v15  ;;  %v368_v16 = vmul.f32 -0.36631277, %v1166_v44 }
 0x19d   :  { %v306_v20 = vadd.f32 %v305_v18, %v304_v17 }
 0x19f   :  { %v308_v23 = vadd.f32 %v307_v22, %v306_v20  ;;  %v372_v20 = vmul.f32 -0.069405064, %v1140_v62 }
 0x1a1   :  { %vm309_vm13 = vcmp.ge.f32.partialorder %v308_v23, 1.0  ;;  %v374_v23 = vmul.f32 -0.029180223, %v1128_v40 }
 0x1a2   :  { %v857_v24 = vsel %vm309_vm13, 1.0, %v988_v30 }
 0x1a3   :  { %312 = vst [vmem:[#allocation3 + $0xc] sm:$0x1] %v857_v24  ;;  %v314_v25 = vmul.f32 -4.0, %v857_v24  ;;  %v339_v53 = vmul.f32 -2.9430356, %v857_v24  ;;  %v364_v12 = vmul.f32 -1.6240234, %v857_v24 }
 0x1a5   :  { %v315_v27 = vadd.f32 %v314_v25, %v313_v26  ;;  %v376_v26 = vmul.f32 -0.0120766545, %v1117_v21  ;;  %v476_v21 = vld [vmem:[%s1418_s3 + $0x8] sm:$0xff] }
 0x1a7   :  { %v317_v31 = vadd.f32 %v316_v28, %v315_v27 }
 0x1a9   :  { %v319_v32 = vadd.f32 %v318_v29, %v317_v31 }
 0x1ab   :  { %v321_v34 = vadd.f32 %v320_v33, %v319_v32 }
 0x1ad   :  { %v323_v49 = vadd.f32 %v322_v36, %v321_v34 }
 0x1af   :  { %v325_v38 = vadd.f32 %v324_v37, %v323_v49 }
 0x1b1   :  { %v327_v42 = vadd.f32 %v326_v39, %v325_v38 }
 0x1b3   :  { %v329_v45 = vadd.f32 %v328_v43, %v327_v42 }
 0x1b5   :  { %v331_v47 = vadd.f32 %v330_v46, %v329_v45 }
 0x1b7   :  { %vm332_vm14 = vcmp.ge.f32.partialorder %v331_v47, 1.0 }
 0x1b8   :  { %v858_v48 = vsel %vm332_vm14, 1.0, %v988_v30 }
 0x1b9   :  { %335 = vst [vmem:[#allocation3 + $0xd] sm:$0x1] %v858_v48  ;;  %v337_v50 = vmul.f32 -4.0, %v858_v48  ;;  %v362_v11 = vmul.f32 -2.9430356, %v858_v48 }
 0x1bb   :  { %v338_v52 = vadd.f32 %v337_v50, %v336_v51 }
 0x1bd   :  { %v340_v35 = vadd.f32 %v339_v53, %v338_v52 }
 0x1bf   :  { %v342_v55 = vadd.f32 %v341_v54, %v340_v35 }
 0x1c1   :  { %v344_v57 = vadd.f32 %v343_v56, %v342_v55 }
 0x1c3   :  { %v346_v60 = vadd.f32 %v345_v58, %v344_v57 }
 0x1c5   :  { %v348_v61 = vadd.f32 %v347_v59, %v346_v60 }
 0x1c7   :  { %v350_v0 = vadd.f32 %v349_v63, %v348_v61 }
 0x1c9   :  { %v352_v3 = vadd.f32 %v351_v1, %v350_v0 }
 0x1cb   :  { %v354_v5 = vadd.f32 %v353_v4, %v352_v3 }
 0x1cd   :  { %vm355_vm15 = vcmp.ge.f32.partialorder %v354_v5, 1.0 }
 0x1ce   :  { %v859_v6 = vsel %vm355_vm15, 1.0, %v988_v30 }
 0x1cf   :  { %358 = vst [vmem:[#allocation3 + $0xe] sm:$0x1] %v859_v6  ;;  %v360_v8 = vmul.f32 -4.0, %v859_v6 }
 0x1d1   :  { %v361_v10 = vadd.f32 %v360_v8, %v359_v9 }
 0x1d3   :  { %v363_v41 = vadd.f32 %v362_v11, %v361_v10 }
 0x1d5   :  { %v365_v13 = vadd.f32 %v364_v12, %v363_v41 }
 0x1d7   :  { %v367_v15 = vadd.f32 %v366_v14, %v365_v13 }
 0x1d9   :  { %v369_v17 = vadd.f32 %v368_v16, %v367_v15 }
 0x1db   :  { %v371_v18 = vadd.f32 %v370_v7, %v369_v17 }
 0x1dd   :  { %v373_v22 = vadd.f32 %v372_v20, %v371_v18 }
 0x1df   :  { %v375_v25 = vadd.f32 %v374_v23, %v373_v22 }
 0x1e1   :  { %v377_v27 = vadd.f32 %v376_v26, %v375_v25 }
 0x1e3   :  { %vm378_vm0 = vcmp.ge.f32.partialorder %v377_v27, 1.0 }
 0x1e4   :  { %v860_v24 = vsel %vm378_vm0, 1.0, %v988_v30 }
 0x1e5   :  { %381 = vst [vmem:[#allocation3 + $0xf] sm:$0x1] %v860_v24 }
 0x1ec   :  { %v383_v2 = vld [vmem:[#allocation3 + $0x8] sm:$0xff] }
 0x1ed   :  { %942 = vmatmul.mubr.f32.vlgmr.msra.gmra.mrb[0].mxu1 %v383_v2 }
 0x2c0   :  { %v943_v62 = vpop.f32.mrb[0].mxu1 }
 0x2c1   :  { %v466_v44 = vpop.f32.mrb[1].mxu1 }
 0x2c2   :  { %v983_v28 = vpack.c.bf16 %v943_v62, %v466_v44 }
 0x2c4   :  { %984 = vmatprep.subr.bf16.mxu0 %v983_v28 }
 0x2c5   :  { %986 = vmatpush3.bf16.msra.mxu0 %v983_v28 }
 0x2c8   :  { %949 = vmatmul.mubr.msk.f32.vlgmr.msra.gmra.mrb[2].mxu0 %vm477_vm1, %v476_v21 }
 0x39b   :  { %v950_v40 = vpop.f32.mrb[2].mxu0 }
 0x39c   :  { %560 = vst [vmem:[#allocation4 + $0x8] sm:$0xff] %v950_v40  ;;  %v550_v31 = vpop.f32.mrb[3].mxu0 }
 0x39d   :  { %559 = vst [vmem:[#allocation4] sm:$0xff] %v550_v31 }
 0x3a4   :  { %v561_v29 = vld [vmem:[#allocation4] sm:$0x1]  ;;  %v566_v34 = vld [vmem:[#allocation4 + $0x1] sm:$0x1]  ;;  %v573_v38 = vld [vmem:[#allocation4 + $0x2] sm:$0x1] }
 0x3a5   :  { %vm562_vm2 = vcmp.ge.f32.partialorder %v561_v29, 1.0  ;;  %v582_v47 = vld [vmem:[#allocation4 + $0x3] sm:$0x1]  ;;  %v593_v55 = vld [vmem:[#allocation4 + $0x4] sm:$0x1] }
 0x3a6   :  { %v1223_v32 = vsel %vm562_vm2, 1.0, %v988_v30  ;;  %v606_v3 = vld [vmem:[#allocation4 + $0x5] sm:$0x1]  ;;  %v621_v15 = vld [vmem:[#allocation4 + $0x6] sm:$0x1] }
 0x3a7   :  { %565 = vst [vmem:[%s1419_s4] sm:$0x1] %v1223_v32  ;;  %v567_v33 = vmul.f32 -4.0, %v1223_v32  ;;  %v576_v42 = vmul.f32 -2.9430356, %v1223_v32  ;;  %v587_v52 = vmul.f32 -1.6240234, %v1223_v32 }
 0x3a8   :  { %v600_v61 = vmul.f32 -0.79659307, %v1223_v32  ;;  %v615_v41 = vmul.f32 -0.36631277, %v1223_v32  ;;  %v632_v27 = vmul.f32 -0.16171072, %v1223_v32 }
 0x3a9   :  { %v568_v36 = vadd.f32 %v567_v33, %v566_v34  ;;  %v638_v62 = vld [vmem:[#allocation4 + $0x7] sm:$0x1] }
 0x3ab   :  { %vm569_vm3 = vcmp.ge.f32.partialorder %v568_v36, 1.0 }
 0x3ac   :  { %v1231_v49 = vsel %vm569_vm3, 1.0, %v988_v30 }
 0x3ad   :  { %572 = vst [vmem:[%s1419_s4 + $0x1] sm:$0x1] %v1231_v49  ;;  %v574_v37 = vmul.f32 -4.0, %v1231_v49  ;;  %v585_v50 = vmul.f32 -2.9430356, %v1231_v49  ;;  %v598_v60 = vmul.f32 -1.6240234, %v1231_v49 }
 0x3ae   :  { %v613_v10 = vmul.f32 -0.79659307, %v1231_v49  ;;  %v630_v25 = vmul.f32 -0.36631277, %v1231_v49 }
 0x3af   :  { %v575_v39 = vadd.f32 %v574_v37, %v573_v38  ;;  %v649_v37 = vmul.f32 -0.16171072, %v1231_v49 }
 0x3b1   :  { %v577_v43 = vadd.f32 %v576_v42, %v575_v39  ;;  %v651_v39 = vmul.f32 -0.069405064, %v1223_v32 }
 0x3b3   :  { %vm578_vm4 = vcmp.ge.f32.partialorder %v577_v43, 1.0 }
 0x3b4   :  { %v1240_v45 = vsel %vm578_vm4, 1.0, %v988_v30 }
 0x3b5   :  { %581 = vst [vmem:[%s1419_s4 + $0x2] sm:$0x1] %v1240_v45  ;;  %v583_v46 = vmul.f32 -4.0, %v1240_v45  ;;  %v596_v57 = vmul.f32 -2.9430356, %v1240_v45  ;;  %v611_v8 = vmul.f32 -1.6240234, %v1240_v45 }
 0x3b6   :  { %v628_v22 = vmul.f32 -0.79659307, %v1240_v45  ;;  %v647_v34 = vmul.f32 -0.36631277, %v1240_v45 }
 0x3b7   :  { %v584_v48 = vadd.f32 %v583_v46, %v582_v47  ;;  %v657_v47 = vld [vmem:[#allocation4 + $0x8] sm:$0x1] }
 0x3b9   :  { %v586_v51 = vadd.f32 %v585_v50, %v584_v48 }
 0x3bb   :  { %v588_v53 = vadd.f32 %v587_v52, %v586_v51 }
 0x3bd   :  { %vm589_vm5 = vcmp.ge.f32.partialorder %v588_v53, 1.0 }
 0x3be   :  { %v1250_v35 = vsel %vm589_vm5, 1.0, %v988_v30 }
 0x3bf   :  { %592 = vst [vmem:[%s1419_s4 + $0x3] sm:$0x1] %v1250_v35  ;;  %v594_v54 = vmul.f32 -4.0, %v1250_v35  ;;  %v609_v5 = vmul.f32 -2.9430356, %v1250_v35  ;;  %v626_v18 = vmul.f32 -1.6240234, %v1250_v35 }
 0x3c0   :  { %v645_v29 = vmul.f32 -0.79659307, %v1250_v35 }
 0x3c1   :  { %v595_v56 = vadd.f32 %v594_v54, %v593_v55 }
 0x3c3   :  { %v597_v58 = vadd.f32 %v596_v57, %v595_v56  ;;  %v666_v56 = vmul.f32 -0.36631277, %v1250_v35 }
 0x3c5   :  { %v599_v59 = vadd.f32 %v598_v60, %v597_v58  ;;  %v668_v58 = vmul.f32 -0.16171072, %v1240_v45 }
 0x3c7   :  { %v601_v63 = vadd.f32 %v600_v61, %v599_v59  ;;  %v670_v59 = vmul.f32 -0.069405064, %v1231_v49 }
 0x3c9   :  { %vm602_vm6 = vcmp.ge.f32.partialorder %v601_v63, 1.0  ;;  %v672_v63 = vmul.f32 -0.029180223, %v1223_v32 }
 0x3ca   :  { %v1261_v0 = vsel %vm602_vm6, 1.0, %v988_v30 }
 0x3cb   :  { %605 = vst [vmem:[%s1419_s4 + $0x4] sm:$0x1] %v1261_v0  ;;  %v607_v1 = vmul.f32 -4.0, %v1261_v0  ;;  %v624_v17 = vmul.f32 -2.9430356, %v1261_v0  ;;  %v643_v40 = vmul.f32 -1.6240234, %v1261_v0 }
 0x3cc   :  { %v664_v54 = vmul.f32 -0.79659307, %v1261_v0 }
 0x3cd   :  { %v608_v4 = vadd.f32 %v607_v1, %v606_v3 }
 0x3cf   :  { %v610_v6 = vadd.f32 %v609_v5, %v608_v4  ;;  %v678_v5 = vld [vmem:[#allocation4 + $0x9] sm:$0x1] }
 0x3d1   :  { %v612_v9 = vadd.f32 %v611_v8, %v610_v6 }
 0x3d3   :  { %v614_v11 = vadd.f32 %v613_v10, %v612_v9 }
 0x3d5   :  { %v616_v12 = vadd.f32 %v615_v41, %v614_v11 }
 0x3d7   :  { %vm617_vm7 = vcmp.ge.f32.partialorder %v616_v12, 1.0 }
 0x3d8   :  { %v1273_v13 = vsel %vm617_vm7, 1.0, %v988_v30 }
 0x3d9   :  { %620 = vst [vmem:[%s1419_s4 + $0x5] sm:$0x1] %v1273_v13  ;;  %v622_v14 = vmul.f32 -4.0, %v1273_v13  ;;  %v641_v28 = vmul.f32 -2.9430356, %v1273_v13  ;;  %v662_v52 = vmul.f32 -1.6240234, %v1273_v13 }
 0x3da   :  { %v685_v41 = vmul.f32 -0.79659307, %v1273_v13 }
 0x3db   :  { %v623_v16 = vadd.f32 %v622_v14, %v621_v15  ;;  %v687_v14 = vmul.f32 -0.36631277, %v1261_v0 }
 0x3dd   :  { %v625_v7 = vadd.f32 %v624_v17, %v623_v16  ;;  %v689_v16 = vmul.f32 -0.16171072, %v1250_v35 }
 0x3df   :  { %v627_v20 = vadd.f32 %v626_v18, %v625_v7  ;;  %v691_v7 = vmul.f32 -0.069405064, %v1240_v45 }
 0x3e1   :  { %v629_v23 = vadd.f32 %v628_v22, %v627_v20  ;;  %v693_v20 = vmul.f32 -0.029180223, %v1231_v49 }
 0x3e3   :  { %v631_v26 = vadd.f32 %v630_v25, %v629_v23  ;;  %v695_v23 = vmul.f32 -0.0120766545, %v1223_v32 }
 0x3e5   :  { %v633_v24 = vadd.f32 %v632_v27, %v631_v26 }
 0x3e7   :  { %vm634_vm8 = vcmp.ge.f32.partialorder %v633_v24, 1.0  ;;  %v701_v24 = vld [vmem:[#allocation4 + $0xa] sm:$0x1] }
 0x3e8   :  { %v1286_v2 = vsel %vm634_vm8, 1.0, %v988_v30 }
 0x3e9   :  { %637 = vst [vmem:[%s1419_s4 + $0x6] sm:$0x1] %v1286_v2  ;;  %v639_v19 = vmul.f32 -4.0, %v1286_v2  ;;  %v660_v50 = vmul.f32 -2.9430356, %v1286_v2  ;;  %v683_v10 = vmul.f32 -1.6240234, %v1286_v2 }
 0x3eb   :  { %v640_v44 = vadd.f32 %v639_v19, %v638_v62 }
 0x3ed   :  { %v642_v21 = vadd.f32 %v641_v28, %v640_v44 }
 0x3ef   :  { %v644_v31 = vadd.f32 %v643_v40, %v642_v21  ;;  %v708_v21 = vmul.f32 -0.79659307, %v1286_v2 }
 0x3f1   :  { %v646_v33 = vadd.f32 %v645_v29, %v644_v31  ;;  %v710_v31 = vmul.f32 -0.36631277, %v1273_v13 }
 0x3f3   :  { %v648_v36 = vadd.f32 %v647_v34, %v646_v33  ;;  %v712_v33 = vmul.f32 -0.16171072, %v1261_v0 }
 0x3f5   :  { %v650_v38 = vadd.f32 %v649_v37, %v648_v36  ;;  %v714_v36 = vmul.f32 -0.069405064, %v1250_v35 }
 0x3f7   :  { %v652_v42 = vadd.f32 %v651_v39, %v650_v38  ;;  %v716_v38 = vmul.f32 -0.029180223, %v1240_v45 }
 0x3f9   :  { %vm653_vm9 = vcmp.ge.f32.partialorder %v652_v42, 1.0  ;;  %v718_v42 = vmul.f32 -0.0120766545, %v1231_v49 }
 0x3fa   :  { %v1300_v43 = vsel %vm653_vm9, 1.0, %v988_v30 }
 0x3fb   :  { %656 = vst [vmem:[%s1419_s4 + $0x7] sm:$0x1] %v1300_v43  ;;  %v658_v46 = vmul.f32 -4.0, %v1300_v43  ;;  %v681_v8 = vmul.f32 -2.9430356, %v1300_v43  ;;  %v706_v28 = vmul.f32 -1.6240234, %v1300_v43 }
 0x3fd   :  { %v659_v48 = vadd.f32 %v658_v46, %v657_v47 }
 0x3ff   :  { %v661_v51 = vadd.f32 %v660_v50, %v659_v48  ;;  %v724_v50 = vld [vmem:[#allocation4 + $0xb] sm:$0x1] }
 0x401   :  { %v663_v53 = vadd.f32 %v662_v52, %v661_v51 }
 0x403   :  { %v665_v55 = vadd.f32 %v664_v54, %v663_v53 }
 0x405   :  { %v667_v57 = vadd.f32 %v666_v56, %v665_v55  ;;  %v731_v55 = vmul.f32 -0.79659307, %v1300_v43 }
 0x407   :  { %v669_v60 = vadd.f32 %v668_v58, %v667_v57  ;;  %v733_v57 = vmul.f32 -0.36631277, %v1286_v2 }
 0x409   :  { %v671_v61 = vadd.f32 %v670_v59, %v669_v60  ;;  %v735_v60 = vmul.f32 -0.16171072, %v1273_v13 }
 0x40b   :  { %v673_v1 = vadd.f32 %v672_v63, %v671_v61  ;;  %v737_v61 = vmul.f32 -0.069405064, %v1261_v0 }
 0x40d   :  { %vm674_vm10 = vcmp.ge.f32.partialorder %v673_v1, 1.0  ;;  %v739_v1 = vmul.f32 -0.029180223, %v1250_v35 }
 0x40e   :  { %v1315_v3 = vsel %vm674_vm10, 1.0, %v988_v30 }
 0x40f   :  { %677 = vst [vmem:[%s1419_s4 + $0x8] sm:$0x1] %v1315_v3  ;;  %v679_v4 = vmul.f32 -4.0, %v1315_v3  ;;  %v704_v62 = vmul.f32 -2.9430356, %v1315_v3  ;;  %v729_v54 = vmul.f32 -1.6240234, %v1315_v3 }
 0x411   :  { %v680_v6 = vadd.f32 %v679_v4, %v678_v5  ;;  %v741_v5 = vmul.f32 -0.0120766545, %v1240_v45 }
 0x413   :  { %v682_v9 = vadd.f32 %v681_v8, %v680_v6 }
 0x415   :  { %v684_v11 = vadd.f32 %v683_v10, %v682_v9  ;;  %v747_v10 = vld [vmem:[#allocation4 + $0xc] sm:$0x1] }
 0x417   :  { %v686_v12 = vadd.f32 %v685_v41, %v684_v11 }
 0x419   :  { %v688_v15 = vadd.f32 %v687_v14, %v686_v12 }
 0x41b   :  { %v690_v17 = vadd.f32 %v689_v16, %v688_v15  ;;  %v754_v15 = vmul.f32 -0.79659307, %v1315_v3 }
 0x41d   :  { %v692_v18 = vadd.f32 %v691_v7, %v690_v17  ;;  %v756_v17 = vmul.f32 -0.36631277, %v1300_v43 }
 0x41f   :  { %v694_v22 = vadd.f32 %v693_v20, %v692_v18  ;;  %v758_v18 = vmul.f32 -0.16171072, %v1286_v2 }
 0x421   :  { %v696_v25 = vadd.f32 %v695_v23, %v694_v22  ;;  %v760_v22 = vmul.f32 -0.069405064, %v1273_v13 }
 0x423   :  { %vm697_vm11 = vcmp.ge.f32.partialorder %v696_v25, 1.0  ;;  %v762_v25 = vmul.f32 -0.029180223, %v1261_v0 }
 0x424   :  { %v1331_v26 = vsel %vm697_vm11, 1.0, %v988_v30 }
 0x425   :  { %700 = vst [vmem:[%s1419_s4 + $0x9] sm:$0x1] %v1331_v26  ;;  %v702_v27 = vmul.f32 -4.0, %v1331_v26  ;;  %v727_v52 = vmul.f32 -2.9430356, %v1331_v26  ;;  %v752_v14 = vmul.f32 -1.6240234, %v1331_v26 }
 0x427   :  { %v703_v19 = vadd.f32 %v702_v27, %v701_v24  ;;  %v764_v24 = vmul.f32 -0.0120766545, %v1250_v35 }
 0x429   :  { %v705_v44 = vadd.f32 %v704_v62, %v703_v19 }
 0x42b   :  { %v707_v32 = vadd.f32 %v706_v28, %v705_v44  ;;  %v770_v28 = vld [vmem:[#allocation4 + $0xd] sm:$0x1] }
 0x42d   :  { %v709_v40 = vadd.f32 %v708_v21, %v707_v32 }
 0x42f   :  { %v711_v29 = vadd.f32 %v710_v31, %v709_v40 }
 0x431   :  { %v713_v34 = vadd.f32 %v712_v33, %v711_v29  ;;  %v777_v33 = vmul.f32 -0.79659307, %v1331_v26 }
 0x433   :  { %v715_v37 = vadd.f32 %v714_v36, %v713_v34  ;;  %v779_v34 = vmul.f32 -0.36631277, %v1315_v3 }
 0x435   :  { %v717_v39 = vadd.f32 %v716_v38, %v715_v37  ;;  %v781_v37 = vmul.f32 -0.16171072, %v1300_v43 }
 0x437   :  { %v719_v46 = vadd.f32 %v718_v42, %v717_v39  ;;  %v783_v39 = vmul.f32 -0.069405064, %v1286_v2 }
 0x439   :  { %vm720_vm12 = vcmp.ge.f32.partialorder %v719_v46, 1.0  ;;  %v785_v46 = vmul.f32 -0.029180223, %v1273_v13 }
 0x43a   :  { %v1347_v47 = vsel %vm720_vm12, 1.0, %v988_v30 }
 0x43b   :  { %723 = vst [vmem:[%s1419_s4 + $0xa] sm:$0x1] %v1347_v47  ;;  %v725_v48 = vmul.f32 -4.0, %v1347_v47  ;;  %v750_v41 = vmul.f32 -2.9430356, %v1347_v47  ;;  %v775_v31 = vmul.f32 -1.6240234, %v1347_v47 }
 0x43d   :  { %v726_v51 = vadd.f32 %v725_v48, %v724_v50  ;;  %v787_v50 = vmul.f32 -0.0120766545, %v1261_v0  ;;  %v802_v0 = vmul.f32 -0.36631277, %v1331_v26 }
 0x43f   :  { %v728_v53 = vadd.f32 %v727_v52, %v726_v51 }
 0x441   :  { %v730_v49 = vadd.f32 %v729_v54, %v728_v53  ;;  %v793_v54 = vld [vmem:[#allocation4 + $0xe] sm:$0x1] }
 0x443   :  { %v732_v56 = vadd.f32 %v731_v55, %v730_v49 }
 0x445   :  { %v734_v58 = vadd.f32 %v733_v57, %v732_v56 }
 0x447   :  { %v736_v59 = vadd.f32 %v735_v60, %v734_v58  ;;  %v800_v60 = vmul.f32 -0.79659307, %v1347_v47 }
 0x449   :  { %v738_v63 = vadd.f32 %v737_v61, %v736_v59 }
 0x44b   :  { %v740_v4 = vadd.f32 %v739_v1, %v738_v63  ;;  %v804_v63 = vmul.f32 -0.16171072, %v1315_v3 }
 0x44d   :  { %v742_v6 = vadd.f32 %v741_v5, %v740_v4  ;;  %v806_v4 = vmul.f32 -0.069405064, %v1300_v43 }
 0x44f   :  { %vm743_vm13 = vcmp.ge.f32.partialorder %v742_v6, 1.0  ;;  %v808_v6 = vmul.f32 -0.029180223, %v1286_v2 }
 0x450   :  { %v1363_v8 = vsel %vm743_vm13, 1.0, %v988_v30 }
 0x451   :  { %746 = vst [vmem:[%s1419_s4 + $0xb] sm:$0x1] %v1363_v8  ;;  %v748_v9 = vmul.f32 -4.0, %v1363_v8  ;;  %v773_v21 = vmul.f32 -2.9430356, %v1363_v8  ;;  %v798_v57 = vmul.f32 -1.6240234, %v1363_v8 }
 0x453   :  { %v749_v11 = vadd.f32 %v748_v9, %v747_v10  ;;  %v810_v10 = vmul.f32 -0.0120766545, %v1273_v13  ;;  %v825_v13 = vmul.f32 -0.36631277, %v1347_v47 }
 0x455   :  { %v751_v12 = vadd.f32 %v750_v41, %v749_v11 }
 0x457   :  { %v753_v45 = vadd.f32 %v752_v14, %v751_v12  ;;  %v816_v14 = vld [vmem:[#allocation4 + $0xf] sm:$0x1] }
 0x459   :  { %v755_v16 = vadd.f32 %v754_v15, %v753_v45 }
 0x45b   :  { %v757_v7 = vadd.f32 %v756_v17, %v755_v16 }
 0x45d   :  { %v759_v20 = vadd.f32 %v758_v18, %v757_v7  ;;  %v823_v18 = vmul.f32 -0.79659307, %v1363_v8 }
 0x45f   :  { %v761_v23 = vadd.f32 %v760_v22, %v759_v20 }
 0x461   :  { %v763_v27 = vadd.f32 %v762_v25, %v761_v23  ;;  %v827_v23 = vmul.f32 -0.16171072, %v1331_v26 }
 0x463   :  { %v765_v19 = vadd.f32 %v764_v24, %v763_v27  ;;  %v829_v27 = vmul.f32 -0.069405064, %v1315_v3 }
 0x465   :  { %vm766_vm14 = vcmp.ge.f32.partialorder %v765_v19, 1.0  ;;  %v831_v19 = vmul.f32 -0.029180223, %v1300_v43 }
 0x466   :  { %v875_v62 = vsel %vm766_vm14, 1.0, %v988_v30 }
 0x467   :  { %769 = vst [vmem:[%s1419_s4 + $0xc] sm:$0x1] %v875_v62  ;;  %v771_v44 = vmul.f32 -4.0, %v875_v62  ;;  %v796_v55 = vmul.f32 -2.9430356, %v875_v62  ;;  %v821_v17 = vmul.f32 -1.6240234, %v875_v62 }
 0x469   :  { %v772_v32 = vadd.f32 %v771_v44, %v770_v28  ;;  %v833_v28 = vmul.f32 -0.0120766545, %v1286_v2 }
 0x46b   :  { %v774_v40 = vadd.f32 %v773_v21, %v772_v32 }
 0x46d   :  { %v776_v29 = vadd.f32 %v775_v31, %v774_v40 }
 0x46f   :  { %v778_v35 = vadd.f32 %v777_v33, %v776_v29 }
 0x471   :  { %v780_v36 = vadd.f32 %v779_v34, %v778_v35 }
 0x473   :  { %v782_v38 = vadd.f32 %v781_v37, %v780_v36 }
 0x475   :  { %v784_v42 = vadd.f32 %v783_v39, %v782_v38 }
 0x477   :  { %v786_v48 = vadd.f32 %v785_v46, %v784_v42 }
 0x479   :  { %v788_v51 = vadd.f32 %v787_v50, %v786_v48 }
 0x47b   :  { %vm789_vm15 = vcmp.ge.f32.partialorder %v788_v51, 1.0 }
 0x47c   :  { %v876_v52 = vsel %vm789_vm15, 1.0, %v988_v30 }
 0x47d   :  { %792 = vst [vmem:[%s1419_s4 + $0xd] sm:$0x1] %v876_v52  ;;  %v794_v53 = vmul.f32 -4.0, %v876_v52  ;;  %v819_v15 = vmul.f32 -2.9430356, %v876_v52 }
 0x47f   :  { %v795_v49 = vadd.f32 %v794_v53, %v793_v54 }
 0x481   :  { %v797_v56 = vadd.f32 %v796_v55, %v795_v49 }
 0x483   :  { %v799_v58 = vadd.f32 %v798_v57, %v797_v56 }
 0x485   :  { %v801_v59 = vadd.f32 %v800_v60, %v799_v58 }
 0x487   :  { %v803_v61 = vadd.f32 %v802_v0, %v801_v59 }
 0x489   :  { %v805_v1 = vadd.f32 %v804_v63, %v803_v61 }
 0x48b   :  { %v807_v5 = vadd.f32 %v806_v4, %v805_v1 }
 0x48d   :  { %v809_v9 = vadd.f32 %v808_v6, %v807_v5 }
 0x48f   :  { %v811_v11 = vadd.f32 %v810_v10, %v809_v9 }
 0x491   :  { %vm812_vm0 = vcmp.ge.f32.partialorder %v811_v11, 1.0 }
 0x492   :  { %v877_v41 = vsel %vm812_vm0, 1.0, %v988_v30 }
 0x493   :  { %815 = vst [vmem:[%s1419_s4 + $0xe] sm:$0x1] %v877_v41  ;;  %v817_v12 = vmul.f32 -4.0, %v877_v41 }
 0x495   :  { %v818_v45 = vadd.f32 %v817_v12, %v816_v14 }
 0x497   :  { %v820_v16 = vadd.f32 %v819_v15, %v818_v45 }
 0x499   :  { %v822_v7 = vadd.f32 %v821_v17, %v820_v16 }
 0x49b   :  { %v824_v20 = vadd.f32 %v823_v18, %v822_v7 }
 0x49d   :  { %v826_v22 = vadd.f32 %v825_v13, %v824_v20 }
 0x49f   :  { %v828_v25 = vadd.f32 %v827_v23, %v826_v22 }
 0x4a1   :  { %v830_v24 = vadd.f32 %v829_v27, %v828_v25 }
 0x4a3   :  { %v832_v44 = vadd.f32 %v831_v19, %v830_v24 }
 0x4a5   :  { %v834_v32 = vadd.f32 %v833_v28, %v832_v44 }
 0x4a7   :  { %vm835_vm1 = vcmp.ge.f32.partialorder %v834_v32, 1.0 }
 0x4a8   :  { %v878_v62 = vsel %vm835_vm1, 1.0, %v988_v30 }
 0x4a9   :  { %838 = vst [vmem:[%s1419_s4 + $0xf] sm:$0x1] %v878_v62 }

</bundles_post_ra>
